<compile_context>
chip_gen: v5e
topology: v5e:2x2
jax: 0.10.0
libtpu: 0.0.40
codegen_flags: <defaults>
</compile_context>

<pallas_src>
import math

import jax
import jax.numpy as jnp
from jax.experimental import pallas as pl
from jax.experimental.pallas import tpu as pltpu


def _round_up(x: int, m: int) -> int:
    return (x + m - 1) // m * m


def _pick_tile(total: int, target: int) -> int:
    """Largest multiple of 128 that divides `total` (a multiple of 128) and is
    <= target, so the grid evenly covers the padded dim (no partially-OOB
    blocks feeding the contraction)."""
    if total <= target:
        return total
    for cand in range(target - target % 128, 127, -128):
        if total % cand == 0:
            return cand
    return 128


def _swiglu_kernel(x_ref, w1_ref, b1_ref, w2_ref, b2_ref, o_ref,
                   acc1_ref, acc2_ref):
    """Fused (x @ W1 + b1) * sigmoid(x @ W2 + b2), f32 accumulation in VMEM.

    Grid = (d_out_tiles, batch_tiles, k_tiles).  K is the trailing
    'arbitrary' reduction axis: the output block and the two f32 accumulators
    stay resident across it (init at k==0, epilogue at k==last).
    """
    k = pl.program_id(2)

    @pl.when(k == 0)
    def _init():
        acc1_ref[...] = jnp.zeros_like(acc1_ref)
        acc2_ref[...] = jnp.zeros_like(acc2_ref)

    x = x_ref[...]  # bf16 tile; MXU accumulates in f32.
    acc1_ref[...] += jnp.dot(x, w1_ref[...], preferred_element_type=jnp.float32)
    acc2_ref[...] += jnp.dot(x, w2_ref[...], preferred_element_type=jnp.float32)

    @pl.when(k == pl.num_programs(2) - 1)
    def _epilogue():
        g1 = acc1_ref[...] + b1_ref[...]
        g2 = acc2_ref[...] + b2_ref[...]
        # sigmoid = 1 / (1 + exp(-g2)); exp and approx reciprocal both use the
        # EUP slot, so the epilogue hides under the MXU work.
        sig = pl.reciprocal(1.0 + jnp.exp(-g2), approx=True)
        o_ref[...] = (g1 * sig).astype(o_ref.dtype)


def prepare_swiglu_params(w1, b1, w2, b2, *, weight_dtype=jnp.bfloat16):
    """Pad weights/biases to lane-dense (multiple-of-128) shapes and cast the
    weights to bf16 ONCE at parameter-init time (hoisted out of the per-call
    path; the forward is weight-HBM-bound at small batch).

    w1, w2 : (D_in, D_out) stored pre-transposed so y = x @ W + b
    b1, b2 : (D_out,)
    """
    D_in, D_out = w1.shape
    assert w2.shape == (D_in, D_out)
    assert b1.shape == (D_out,) and b2.shape == (D_out,)
    k_pad = _round_up(D_in, 128)
    d_pad = _round_up(D_out, 128)
    pad_w = ((0, k_pad - D_in), (0, d_pad - D_out))
    w1p = jnp.pad(w1, pad_w).astype(weight_dtype)
    w2p = jnp.pad(w2, pad_w).astype(weight_dtype)
    # Biases stay f32: they are added to the f32 accumulator in the epilogue.
    b1p = jnp.pad(b1, (0, d_pad - D_out)).astype(jnp.float32).reshape(1, d_pad)
    b2p = jnp.pad(b2, (0, d_pad - D_out)).astype(jnp.float32).reshape(1, d_pad)
    return {"w1": w1p, "b1": b1p, "w2": w2p, "b2": b2p,
            "d_in": D_in, "d_out": D_out}


def swiglu(x, params, *, block_m: int = 512, block_n: int = 512,
           block_k: int = 2048, vmem_limit_bytes: int = 48 * 1024 * 1024):
    """SwiGLU forward.  `x` is (N, D_in) f32; `params` from prepare_swiglu_params."""
    w1p, b1p, w2p, b2p = params["w1"], params["b1"], params["w2"], params["b2"]
    D_in, D_out = params["d_in"], params["d_out"]
    N, x_in = x.shape
    assert x_in == D_in
    k_pad, d_pad = w1p.shape

    # ---- tiling -------------------------------------------------------------
    bm = _round_up(min(block_m, _round_up(N, 8)), 8)        # batch rows / tile
    n_pad = _round_up(N, bm)
    tn = _pick_tile(d_pad, block_n)                          # output columns
    tk = _pick_tile(k_pad, block_k)                          # contraction

    # v7x megacore: a single-tile grid leaves one of the two TensorCores idle,
    # so split the batch into (at least) two "parallel" tiles.
    if (n_pad // bm) * (d_pad // tn) == 1 and N >= 16:
        bm = _round_up((n_pad + 1) // 2, 8)
        n_pad = _round_up(N, bm)

    n_d, n_b, n_k = d_pad // tn, n_pad // bm, k_pad // tk
    grid = (n_d, n_b, n_k)

    # ---- activations: pad only if needed, stream as bf16 --------------------
    xp = x
    if (n_pad, k_pad) != (N, D_in):
        xp = jnp.pad(xp, ((0, n_pad - N), (0, k_pad - D_in)))
    xp = xp.astype(w1p.dtype)

    # ---- BlockSpecs ----------------------------------------------------------
    # Blocks whose index never changes over the grid only need one VMEM buffer
    # (default pipelining reserves two) -- saves weight-sized VMEM, critical on
    # v7x (64 MiB/TC).
    w_invariant = (n_d == 1 and n_k == 1)
    b_invariant = (n_d == 1)

    def _spec(shape, index_map, invariant):
        if invariant:
            return pl.BlockSpec(shape, index_map, pipeline_mode=pl.Buffered(1))
        return pl.BlockSpec(shape, index_map)

    x_spec = pl.BlockSpec((bm, tk), lambda j, i, k: (i, k))
    w_spec = _spec((tk, tn), lambda j, i, k: (k, j), w_invariant)
    b_spec = _spec((1, tn), lambda j, i, k: (0, j), b_invariant)
    o_spec = pl.BlockSpec((bm, tn), lambda j, i, k: (i, j))

    out_p = pl.pallas_call(
        _swiglu_kernel,
        out_shape=jax.ShapeDtypeStruct((n_pad, d_pad), x.dtype),
        grid=grid,
        in_specs=[x_spec, w_spec, b_spec, w_spec, b_spec],
        out_specs=o_spec,
        scratch_shapes=[pltpu.VMEM((bm, tn), jnp.float32),
                        pltpu.VMEM((bm, tn), jnp.float32)],
        compiler_params=pltpu.CompilerParams(
            # d_out and batch tiles are independent -> shard across TCs on v7x;
            # K is the output-resident reduction axis.
            dimension_semantics=("parallel", "parallel", "arbitrary"),
            vmem_limit_bytes=vmem_limit_bytes,
        ),
    )(xp, w1p, b1p, w2p, b2p)

    return out_p[:N, :D_out]


if __name__ == "__main__":
    # Small, TPU-tile-friendly shapes consistent with the PyTorch module.
    batch, input_dim = 256, 256

    key = jax.random.PRNGKey(0)
    kx, k1, k2, k3, k4 = jax.random.split(key, 5)
    bound = 1.0 / math.sqrt(input_dim)          # nn.Linear default init range

    x = jax.random.normal(kx, (batch, input_dim), jnp.float32)
    w1 = jax.random.uniform(k1, (input_dim, input_dim), jnp.float32, -bound, bound)
    b1 = jax.random.uniform(k2, (input_dim,), jnp.float32, -bound, bound)
    w2 = jax.random.uniform(k3, (input_dim, input_dim), jnp.float32, -bound, bound)
    b2 = jax.random.uniform(k4, (input_dim,), jnp.float32, -bound, bound)

    params = prepare_swiglu_params(w1, b1, w2, b2)   # pad + bf16 cast, once
    out = swiglu(x, params)
    jax.block_until_ready(out)

    # Pure-JAX f32 reference (same math as the PyTorch module).  Tolerance is
    # looser than the previous all-f32 version because weights/activations are
    # streamed in bf16 (accumulation stays f32).
    ref = (x @ w1 + b1) * jax.nn.sigmoid(x @ w2 + b2)
    assert out.shape == (batch, input_dim)
    max_err = float(jnp.max(jnp.abs(out - ref)))
    assert max_err < 5e-2, f"mismatch vs reference: {max_err}"

    print("KERNEL_OK")
</pallas_src>

<mosaic_0001>
module attributes {stable_mosaic.version = 11 : i64} {
  func.func @_swiglu_kernel(%arg0: i32, %arg1: i32, %arg2: i32, %arg3: memref<128x256xbf16, #tpu.memory_space<vmem>>, %arg4: memref<256x256xbf16, #tpu.memory_space<vmem>>, %arg5: memref<1x256xf32, #tpu.memory_space<vmem>>, %arg6: memref<256x256xbf16, #tpu.memory_space<vmem>>, %arg7: memref<1x256xf32, #tpu.memory_space<vmem>>, %arg8: memref<128x256xf32, #tpu.memory_space<vmem>>, %arg9: memref<128x256xf32, #tpu.memory_space<vmem>>, %arg10: memref<128x256xf32, #tpu.memory_space<vmem>>) attributes {dimension_semantics = [#tpu.dimension_semantics<parallel>, #tpu.dimension_semantics<parallel>, #tpu.dimension_semantics<arbitrary>], iteration_bounds = array<i64: 1, 2, 1>, scalar_prefetch = 0 : i64, scratch_operands = 2 : i64, tpu.core_type = #tpu.core_type<tc>, window_params = [{transform_indices = @transform_0, window_bounds = array<i64: 128, 256>}, {pipeline_mode = #tpu.pipeline_mode<synchronous>, transform_indices = @transform_1, window_bounds = array<i64: 256, 256>}, {pipeline_mode = #tpu.pipeline_mode<synchronous>, transform_indices = @transform_2, window_bounds = array<i64: 1, 256>}, {pipeline_mode = #tpu.pipeline_mode<synchronous>, transform_indices = @transform_3, window_bounds = array<i64: 256, 256>}, {pipeline_mode = #tpu.pipeline_mode<synchronous>, transform_indices = @transform_4, window_bounds = array<i64: 1, 256>}, {transform_indices = @transform_5, window_bounds = array<i64: 128, 256>}]} {
    %c0_i32 = arith.constant 0 : i32
    %0 = arith.cmpi eq, %arg2, %c0_i32 : i32
    %1 = arith.extui %0 : i1 to i32
    %c0_i32_0 = arith.constant 0 : i32
    %2 = arith.cmpi ne, %1, %c0_i32_0 : i32
    scf.if %2 {
      %cst_17 = arith.constant 0.000000e+00 : f32
      %17 = vector.broadcast %cst_17 : f32 to vector<128x256xf32>
      %c0_18 = arith.constant 0 : index
      %c0_19 = arith.constant 0 : index
      %18 = vector.load %arg9[%c0_18, %c0_19] : memref<128x256xf32, #tpu.memory_space<vmem>>, vector<128x256xf32>
      tpu.vector_store %arg9[%c0_18, %c0_19], %17 {strides = array<i32>} : memref<128x256xf32, #tpu.memory_space<vmem>>, vector<128x256xf32>,
      %cst_20 = arith.constant 0.000000e+00 : f32
      %19 = vector.broadcast %cst_20 : f32 to vector<128x256xf32>
      %c0_21 = arith.constant 0 : index
      %c0_22 = arith.constant 0 : index
      %20 = vector.load %arg10[%c0_21, %c0_22] : memref<128x256xf32, #tpu.memory_space<vmem>>, vector<128x256xf32>
      tpu.vector_store %arg10[%c0_21, %c0_22], %19 {strides = array<i32>} : memref<128x256xf32, #tpu.memory_space<vmem>>, vector<128x256xf32>,
    } else {
    }
    %c0 = arith.constant 0 : index
    %c0_1 = arith.constant 0 : index
    %3 = vector.load %arg3[%c0, %c0_1] : memref<128x256xbf16, #tpu.memory_space<vmem>>, vector<128x256xbf16>
    %c0_2 = arith.constant 0 : index
    %c0_3 = arith.constant 0 : index
    %4 = vector.load %arg9[%c0_2, %c0_3] : memref<128x256xf32, #tpu.memory_space<vmem>>, vector<128x256xf32>
    %c0_4 = arith.constant 0 : index
    %c0_5 = arith.constant 0 : index
    %5 = vector.load %arg4[%c0_4, %c0_5] : memref<256x256xbf16, #tpu.memory_space<vmem>>, vector<256x256xbf16>
    %cst = arith.constant dense<0.000000e+00> : vector<128x256xf32>
    %6 = tpu.matmul %3, %5, %cst {dimension_numbers = #tpu.dot_dimension_numbers<[1], [0], [0], [1], [0, 0, 1, 1], [], []>} : vector<128x256xbf16>, vector<256x256xbf16>, vector<128x256xf32> -> vector<128x256xf32>
    %7 = arith.addf %4, %6 : vector<128x256xf32>
    %c0_6 = arith.constant 0 : index
    %c0_7 = arith.constant 0 : index
    %8 = vector.load %arg9[%c0_6, %c0_7] : memref<128x256xf32, #tpu.memory_space<vmem>>, vector<128x256xf32>
    tpu.vector_store %arg9[%c0_6, %c0_7], %7 {strides = array<i32>} : memref<128x256xf32, #tpu.memory_space<vmem>>, vector<128x256xf32>,
    %c0_8 = arith.constant 0 : index
    %c0_9 = arith.constant 0 : index
    %9 = vector.load %arg10[%c0_8, %c0_9] : memref<128x256xf32, #tpu.memory_space<vmem>>, vector<128x256xf32>
    %c0_10 = arith.constant 0 : index
    %c0_11 = arith.constant 0 : index
    %10 = vector.load %arg6[%c0_10, %c0_11] : memref<256x256xbf16, #tpu.memory_space<vmem>>, vector<256x256xbf16>
    %cst_12 = arith.constant dense<0.000000e+00> : vector<128x256xf32>
    %11 = tpu.matmul %3, %10, %cst_12 {dimension_numbers = #tpu.dot_dimension_numbers<[1], [0], [0], [1], [0, 0, 1, 1], [], []>} : vector<128x256xbf16>, vector<256x256xbf16>, vector<128x256xf32> -> vector<128x256xf32>
    %12 = arith.addf %9, %11 : vector<128x256xf32>
    %c0_13 = arith.constant 0 : index
    %c0_14 = arith.constant 0 : index
    %13 = vector.load %arg10[%c0_13, %c0_14] : memref<128x256xf32, #tpu.memory_space<vmem>>, vector<128x256xf32>
    tpu.vector_store %arg10[%c0_13, %c0_14], %12 {strides = array<i32>} : memref<128x256xf32, #tpu.memory_space<vmem>>, vector<128x256xf32>,
    %c0_i32_15 = arith.constant 0 : i32
    %14 = arith.cmpi eq, %arg2, %c0_i32_15 : i32
    %15 = arith.extui %14 : i1 to i32
    %c0_i32_16 = arith.constant 0 : i32
    %16 = arith.cmpi ne, %15, %c0_i32_16 : i32
    scf.if %16 {
      %c0_17 = arith.constant 0 : index
      %c0_18 = arith.constant 0 : index
      %17 = vector.load %arg9[%c0_17, %c0_18] : memref<128x256xf32, #tpu.memory_space<vmem>>, vector<128x256xf32>
      %c0_19 = arith.constant 0 : index
      %c0_20 = arith.constant 0 : index
      %18 = vector.load %arg5[%c0_19, %c0_20] : memref<1x256xf32, #tpu.memory_space<vmem>>, vector<1x256xf32>
      %19 = vector.broadcast %18 : vector<1x256xf32> to vector<128x256xf32>
      %20 = arith.addf %17, %19 : vector<128x256xf32>
      %c0_21 = arith.constant 0 : index
      %c0_22 = arith.constant 0 : index
      %21 = vector.load %arg10[%c0_21, %c0_22] : memref<128x256xf32, #tpu.memory_space<vmem>>, vector<128x256xf32>
      %c0_23 = arith.constant 0 : index
      %c0_24 = arith.constant 0 : index
      %22 = vector.load %arg7[%c0_23, %c0_24] : memref<1x256xf32, #tpu.memory_space<vmem>>, vector<1x256xf32>
      %23 = vector.broadcast %22 : vector<1x256xf32> to vector<128x256xf32>
      %24 = arith.addf %21, %23 : vector<128x256xf32>
      %cst_25 = arith.constant 0.000000e+00 : f32
      %25 = vector.broadcast %cst_25 : f32 to vector<128x256xf32>
      %26 = arith.subf %25, %24 : vector<128x256xf32>
      %27 = math.exp %26 : vector<128x256xf32>
      %cst_26 = arith.constant 1.000000e+00 : f32
      %28 = vector.broadcast %cst_26 : f32 to vector<128x256xf32>
      %29 = arith.addf %28, %27 : vector<128x256xf32>
      %30 = tpu.reciprocal %29 {approx = true} : vector<128x256xf32> -> vector<128x256xf32>
      %31 = arith.mulf %20, %30 : vector<128x256xf32>
      %c0_27 = arith.constant 0 : index
      %c0_28 = arith.constant 0 : index
      %32 = vector.load %arg8[%c0_27, %c0_28] : memref<128x256xf32, #tpu.memory_space<vmem>>, vector<128x256xf32>
      tpu.vector_store %arg8[%c0_27, %c0_28], %31 {strides = array<i32>} : memref<128x256xf32, #tpu.memory_space<vmem>>, vector<128x256xf32>,
    } else {
    }
    return
  }
  func.func @transform_0(%arg0: i32, %arg1: i32, %arg2: i32) -> (i32, i32) {
    %c0_i32 = arith.constant 0 : i32
    return %arg1, %arg2 : i32, i32
  }
  func.func @transform_1(%arg0: i32, %arg1: i32, %arg2: i32) -> (i32, i32) {
    %c0_i32 = arith.constant 0 : i32
    return %arg2, %arg0 : i32, i32
  }
  func.func @transform_2(%arg0: i32, %arg1: i32, %arg2: i32) -> (i32, i32) {
    %c0_i32 = arith.constant 0 : i32
    %c0_i32_0 = arith.constant 0 : i32
    return %c0_i32, %arg0 : i32, i32
  }
  func.func @transform_3(%arg0: i32, %arg1: i32, %arg2: i32) -> (i32, i32) {
    %c0_i32 = arith.constant 0 : i32
    return %arg2, %arg0 : i32, i32
  }
  func.func @transform_4(%arg0: i32, %arg1: i32, %arg2: i32) -> (i32, i32) {
    %c0_i32 = arith.constant 0 : i32
    %c0_i32_0 = arith.constant 0 : i32
    return %c0_i32, %arg0 : i32, i32
  }
  func.func @transform_5(%arg0: i32, %arg1: i32, %arg2: i32) -> (i32, i32) {
    %c0_i32 = arith.constant 0 : i32
    return %arg1, %arg0 : i32, i32
  }
}

</mosaic_0001>

<bundles_post_ra>
// kernel: tpu_custom_call.1
= control target key start
LH: loop header
LB: loop body
LE: loop exit
PB: predicated region body
PF: predicated region fallthrough
CT: control target
= control target key end

     0   :  { %s3458_s0 = inlined_call_operand.hbm [shape: bf16[256,256], index: 0, kind: input, shape index: {}]   ;;  %s3459_s1 = inlined_call_operand.hbm [shape: bf16[256,256], index: 1, kind: input, shape index: {}]   ;;  %s3460_s2 = inlined_call_operand.hbm [shape: f32[1,256], index: 2, kind: input, shape index: {}]   ;;  %s3461_s3 = inlined_call_operand.hbm [shape: bf16[256,256], index: 3, kind: input, shape index: {}]   ;;  %s3462_s4 = inlined_call_operand.vmem [shape: f32[1,256], index: 4, kind: input, shape index: {}]   ;;  %s3463_s5 = inlined_call_operand.hbm [shape: f32[256,256], index: 5, kind: output, shape index: {}]  }
   0x1   :  { %3466 = sst [smem:[#allocation17_spill]] %s3459_s1 }
   0x2   :  { %3467 = sst [smem:[#allocation18_spill]] %s3460_s2 }
   0x3   :  { %3468 = sst [smem:[#allocation19_spill]] %s3461_s3 }
   0x4   :  { %10 = vsyncpa [#allocation5], 0 }
   0x5   :  { %12 = vsyncpa [#allocation5 + $0x1], 0 }
   0x6   :  { %13 = vsyncpa [#allocation8], 0 }
   0x7   :  { %14 = vsyncpa [#allocation11], 0 }
   0x8   :  { %15 = vsyncpa [#allocation6], 0 }
   0x9   :  { %17 = vsyncpa [#allocation6 + $0x1], 0  ;;  %s2943_s18 = smov 0   ;;  %s2945_s19 = smov 0  }
   0xa   :  { %s2947_s20 = smov 0   ;;  %s2949_s21 = smov 0  }
   0xb   :  { %s2951_s22 = smov 0   ;;  %s2953_s23 = smov 0  }
   0xc LB: > { %s2041_s24 = sadd.s32 4294967295, %s2904_s23   ;;  %s2042_s25 = sadd.s32 4294967294, %s2904_s23   ;;  %s2904_s23 = sphi %s2953_s23, %s23_s23   ;;  %s2900_s22 = sphi %s2951_s22, %s3486_s22   ;;  %s2896_s21 = sphi %s2949_s21, %s3485_s21   ;;  %s2892_s20 = sphi %s2947_s20, %s3484_s20   ;;  %s2888_s19 = sphi %s2945_s19, %s3483_s19   ;;  %s2884_s18 = sphi %s2943_s18, %s3482_s18  }
   0xd   : > { %p64_p0 = scmp.ne.s32.totalorder %s2888_s19, %s2884_s18  ;;  %p2977_p1 = scmp.eq.s32.totalorder %s2041_s24, 0 }
   0xe   : > { %p2981_p2 = scmp.eq.s32.totalorder %s2041_s24, 1  ;;  %p204_p3 = scmp.eq.s32.totalorder %s2042_s25, 1 }
   0xf   : > { %p2987_p4 = por %p2977_p1, %p64_p0  ;;  %p2043_p5 = scmp.ge.s32.totalorder %s2904_s23, 1 }
  0x10   : > { %p2992_p6 = por %p204_p3, %p64_p0  ;;  %p211_p7 = scmp.lt.s32.totalorder %s2904_s23, 3 }
  0x11   : > { %s3473_s1 = sld [smem:[#allocation17_spill]]  ;;  %s2906_s9 = smov [#allocation7]  }
  0x12   : > { %p3000_p8 = pnand %p2043_p5, %p211_p7  ;;  %s230_s10 = sshll.u32 %s2906_s9, 4  ;;  %s231_s10 = int_to_ptr.vmem [resolvable:$true] %s230_s10 }
  0x13   : > { %p2048_p11 = scmp.ge.s32.totalorder %s2904_s23, 2  ;;  %s3476_s2 = sld [smem:[#allocation18_spill]] }
  0x14   : > { %p2485_p9 = pneg %p3000_p8  ;;  %s3464_s15 = smov 128  }
  0x15   : > { %s3465_s16 = smov 8   ;;  %s2909_s17 = smov [#allocation9]  }
  0x16   : > { %p3008_p10 = pnand %p2485_p9, %p2977_p1  ;;  %s247_s24 = sshll.u32 %s2909_s17, 4  ;;  %s248_s24 = int_to_ptr.vmem [resolvable:$true] %s247_s24 }
  0x17   : > { %s228_s7 = sshll.u32 %s3473_s1, 4  ;;  %s3477_s3 = sld [smem:[#allocation19_spill]]  ;;  %s229_s7 = int_to_ptr.hbm [resolvable:$true] %s228_s7 }
  0x18   : > { %2488 = dma.hbm_to_vmem [thread:$0]  (!%p3008_p10), %s229_s7, 4096, %s231_s10, [#allocation8], %s3464_s15, %s3464_s15, %s3465_s16  }
  0x19   : > { %s245_s14 = sshll.u32 %s3476_s2, 4  ;;  %s2910_s9 = smov [#allocation10]   ;;  %s246_s14 = int_to_ptr.hbm [resolvable:$true] %s245_s14 }
  0x1a   : > { %2491 = dma.hbm_to_vmem [thread:$0]  (!%p3008_p10), %s246_s14, 32, %s248_s24, [#allocation8]  }
  0x1b   : > { %s264_s12 = sshll.u32 %s2910_s9, 4  ;;  %s38_s7 = sadd.s32 1, %s2900_s22  ;;  %s265_s12 = int_to_ptr.vmem [resolvable:$true] %s264_s12 }
  0x1c   : > { %p40_p12 = scmp.ge.s32.totalorder %s38_s7, 2  ;;  %s51_s10 = sadd.s32 1, %s2892_s20 }
  0x1d   : > { %s262_s6 = sshll.u32 %s3477_s3, 4  ;;  %p58_p13 = scmp.ne.s32.totalorder %s2892_s20, %s2888_s19  ;;  %s263_s6 = int_to_ptr.hbm [resolvable:$true] %s262_s6 }
  0x1e   : > { %2494 = dma.hbm_to_vmem [thread:$0]  (!%p3008_p10), %s263_s6, 4096, %s265_s12, [#allocation11], %s3464_s15, %s3464_s15, %s3465_s16  }
  0x1f   : > { %p59_p0 = scmp.eq.s32.totalorder %s2904_s23, 0  ;;  %s3488_s7 = smov (%p40_p12, %s38_s7), 0 }
  0x20   : > { %p3044_p5 = por %p2981_p2, %p58_p13  ;;  %s46_s14 = ssub.s32 %s2900_s22, %s3488_s7 }
  0x21   : > { %p3038_p3 = por %p59_p0, %p58_p13  ;;  %p2506_p7 = scmp.lt.s32.totalorder %s2904_s23, 2 }
  0x22   : > { %p49_p9 = scmp.eq.s32.totalorder %s46_s14, 0  ;;  %s286_s17 = sand.u32 1, %s2892_s20  }
  0x23   : > { %s2049_s24 = sshll.u32 %s286_s17, 7  ;;  %s2386_s30 = sshll.u32 %s2900_s22, 7 }
  0x24   : > { %s3053_s25 = scalar_select %p49_p9, %s2892_s20, %s51_s10  }
  0x25   : > { %s298_s12 = scalar_lea.hbm %s3458_s0, %s2386_s30  ;;  %s290_s15 = scalar_lea.vmem [#allocation4], %s2049_s24 }
  0x26   : > { %s301_s16 = sshll.u32 %s290_s15, 4  ;;  %s299_s27 = sshll.u32 %s298_s12, 4  ;;  %s302_s16 = int_to_ptr.vmem [resolvable:$true] %s301_s16  ;;  %s300_s27 = int_to_ptr.hbm [resolvable:$true] %s299_s27 }
  0x27   : > { %p2496_p2 = pnand %p2506_p7, %p3038_p3  ;;  %s287_s1 = scalar_lea.sflag [#allocation5], %s286_s17 }
  0x28   : > { %s3480_s2 = smov 8   ;;  %s3481_s3 = smov 128  }
  0x29   : > { %2498 = dma.hbm_to_vmem [thread:$0]  (!%p2496_p2), %s300_s27, 2048, %s302_s16, %s287_s1, %s3481_s3, %s3481_s3, %s3480_s2  }
  0x2a   : > { %313 = sbr.rel (%p3000_p8) target bundleno = 499 (0x1f3), region = 40  ;;  %s3067_s10 = sand.u32 (!%p3000_p8), 1, %s2888_s19  }
  0x2b   : > { %s2054_s15 = sshll.u32 (!%p3000_p8), %s3067_s10, 7  ;;  %s316_s14 = scalar_lea.sflag (!%p3000_p8), [#allocation5], %s3067_s10 }
  0x2c   : > { %s3071_s24 = scalar_lea.vmem (!%p3000_p8), [#allocation4], %s2054_s15 }
  0x2f   : > { %2867 = dma.done.wait (%p2987_p4), %s316_s14, 2048  }
  0x30   : > { %2869 = vsyncadd (%p2987_p4), %s316_s14, 4294965248 }
  0x31   : > { %2871 = dma.done.wait (%p2977_p1), [#allocation8], 4128  }
  0x32   : > { %2873 = vsyncadd (%p2977_p1), [#allocation8], 4294963168 }
  0x33   : > { %2875 = dma.done.wait (%p2977_p1), [#allocation11], 4096  }
  0x34   : > { %2877 = vsyncadd (%p2977_p1), [#allocation11], 4294963200  ;;  %v2181_v0 = vld [vmem:[#allocation7 + $0x70] sm:$0xf]  ;;  %v2418_v1 = vld [vmem:[#allocation7 + $0x74] sm:$0xf0] }
  0x35   : > { %v2245_v2 = vld [vmem:[#allocation7 + $0xf0] sm:$0xf]  ;;  %v2182_v3 = vor.u32 %v2418_v1, %v2181_v0  ;;  %v2434_v4 = vld [vmem:[#allocation7 + $0xf4] sm:$0xf0]  ;;  %v2417_v5 = vld [vmem:[#allocation7 + $0x74] sm:$0xf] }
  0x36   : > { %v2183_v6 = vld [vmem:[#allocation7 + $0x78] sm:$0xf0]  ;;  %v2246_v7 = vor.u32 %v2434_v4, %v2245_v2  ;;  %v2433_v9 = vld [vmem:[#allocation7 + $0xf4] sm:$0xf]  ;;  %v2173_v11 = vld [vmem:[#allocation7 + $0x60] sm:$0xf] }
  0x37   : > { %v2186_v8 = vor.u32 %v2417_v5, %v2183_v6  ;;  %v2247_v10 = vld [vmem:[#allocation7 + $0xf8] sm:$0xf0]  ;;  %768 = vmatpush.bf16.msra.mxu0 %v2182_v3  ;;  %v2416_v13 = vld [vmem:[#allocation7 + $0x64] sm:$0xf0]  ;;  %v2237_v14 = vld [vmem:[#allocation7 + $0xe0] sm:$0xf] }
  0x38   : > { %v2250_v12 = vor.u32 %v2433_v9, %v2247_v10  ;;  %v2432_v15 = vld [vmem:[#allocation7 + $0xe4] sm:$0xf0]  ;;  %817 = vmatpush.bf16.msra.mxu1 %v2246_v7  ;;  %v2174_v16 = vor.u32 %v2416_v13, %v2173_v11  ;;  %v2415_v18 = vld [vmem:[#allocation7 + $0x64] sm:$0xf]  ;;  %v2175_v19 = vld [vmem:[#allocation7 + $0x68] sm:$0xf0] }
  0x39   : > { %866 = vmatpush.bf16.msra.mxu2 %v2186_v8  ;;  %v2238_v17 = vor.u32 %v2432_v15, %v2237_v14  ;;  %v2431_v20 = vld [vmem:[#allocation7 + $0xe4] sm:$0xf]  ;;  %v2178_v21 = vor.u32 %v2415_v18, %v2175_v19  ;;  %v2239_v22 = vld [vmem:[#allocation7 + $0xe8] sm:$0xf0]  ;;  %v2165_v23 = vld [vmem:[#allocation7 + $0x50] sm:$0xf] }
  0x3a   : > { %915 = vmatpush.bf16.msra.mxu3 %v2250_v12  ;;  %v2414_v24 = vld [vmem:[#allocation7 + $0x54] sm:$0xf0]  ;;  %v2242_v25 = vor.u32 %v2431_v20, %v2239_v22  ;;  %v2229_v26 = vld [vmem:[#allocation7 + $0xd0] sm:$0xf]  ;;  %v2413_v28 = vld [vmem:[#allocation7 + $0x54] sm:$0xf] }
  0x3b   : > { %v2430_v27 = vld [vmem:[#allocation7 + $0xd4] sm:$0xf0]  ;;  %769 = vmatpush.bf16.msra.mxu0 %v2174_v16  ;;  %v2166_v29 = vor.u32 %v2414_v24, %v2165_v23  ;;  %v2167_v30 = vld [vmem:[#allocation7 + $0x58] sm:$0xf0]  ;;  %v2429_v31 = vld [vmem:[#allocation7 + $0xd4] sm:$0xf] }
  0x3c   : > { %v2231_v32 = vld [vmem:[#allocation7 + $0xd8] sm:$0xf0]  ;;  %818 = vmatpush.bf16.msra.mxu1 %v2238_v17  ;;  %v2230_v33 = vor.u32 %v2430_v27, %v2229_v26  ;;  %v2170_v34 = vor.u32 %v2413_v28, %v2167_v30  ;;  %v2157_v35 = vld [vmem:[#allocation7 + $0x40] sm:$0xf]  ;;  %v2412_v36 = vld [vmem:[#allocation7 + $0x44] sm:$0xf0] }
  0x3d   : > { %867 = vmatpush.bf16.msra.mxu2 %v2178_v21  ;;  %v2221_v37 = vld [vmem:[#allocation7 + $0xc0] sm:$0xf]  ;;  %v2234_v38 = vor.u32 %v2429_v31, %v2231_v32  ;;  %v2428_v39 = vld [vmem:[#allocation7 + $0xc4] sm:$0xf0]  ;;  %v2411_v40 = vld [vmem:[#allocation7 + $0x44] sm:$0xf]  ;;  %v2158_v44 = vor.u32 %v2412_v36, %v2157_v35 }
  0x3e   : > { %916 = vmatpush.bf16.msra.mxu3 %v2242_v25  ;;  %v2159_v41 = vld [vmem:[#allocation7 + $0x48] sm:$0xf0]  ;;  %v2427_v42 = vld [vmem:[#allocation7 + $0xc4] sm:$0xf]  ;;  %v2222_v45 = vor.u32 %v2428_v39, %v2221_v37  ;;  %v2149_v47 = vld [vmem:[#allocation7 + $0x30] sm:$0xf] }
  0x3f   : > { %v2223_v43 = vld [vmem:[#allocation7 + $0xc8] sm:$0xf0]  ;;  %770 = vmatpush.bf16.msra.mxu0 %v2166_v29  ;;  %v2162_v46 = vor.u32 %v2411_v40, %v2159_v41  ;;  %v2410_v48 = vld [vmem:[#allocation7 + $0x34] sm:$0xf0]  ;;  %v2213_v49 = vld [vmem:[#allocation7 + $0xb0] sm:$0xf] }
  0x40   : > { %819 = vmatpush.bf16.msra.mxu1 %v2230_v33  ;;  %v2226_v50 = vor.u32 %v2427_v42, %v2223_v43  ;;  %v2426_v51 = vld [vmem:[#allocation7 + $0xb4] sm:$0xf0]  ;;  %v2409_v52 = vld [vmem:[#allocation7 + $0x34] sm:$0xf]  ;;  %v2151_v53 = vld [vmem:[#allocation7 + $0x38] sm:$0xf0]  ;;  %v2150_v56 = vor.u32 %v2410_v48, %v2149_v47 }
  0x41   : > { %868 = vmatpush.bf16.msra.mxu2 %v2170_v34  ;;  %v2425_v54 = vld [vmem:[#allocation7 + $0xb4] sm:$0xf]  ;;  %v2215_v55 = vld [vmem:[#allocation7 + $0xb8] sm:$0xf0]  ;;  %v2214_v57 = vor.u32 %v2426_v51, %v2213_v49  ;;  %v2154_v58 = vor.u32 %v2409_v52, %v2151_v53  ;;  %v2141_v59 = vld [vmem:[#allocation7 + $0x20] sm:$0xf] }
  0x42   : > { %917 = vmatpush.bf16.msra.mxu3 %v2234_v38  ;;  %v2408_v60 = vld [vmem:[#allocation7 + $0x24] sm:$0xf0]  ;;  %v2205_v61 = vld [vmem:[#allocation7 + $0xa0] sm:$0xf]  ;;  %v2218_v62 = vor.u32 %v2425_v54, %v2215_v55  ;;  %v2407_v0 = vld [vmem:[#allocation7 + $0x24] sm:$0xf] }
  0x43   : > { %771 = vmatpush.bf16.msra.mxu0 %v2158_v44  ;;  %v2424_v63 = vld [vmem:[#allocation7 + $0xa4] sm:$0xf0]  ;;  %v2143_v1 = vld [vmem:[#allocation7 + $0x28] sm:$0xf0]  ;;  %v2423_v2 = vld [vmem:[#allocation7 + $0xa4] sm:$0xf]  ;;  %v2142_v4 = vor.u32 %v2408_v60, %v2141_v59 }
  0x44   : > { %820 = vmatpush.bf16.msra.mxu1 %v2222_v45  ;;  %v2207_v3 = vld [vmem:[#allocation7 + $0xa8] sm:$0xf0]  ;;  %v2206_v5 = vor.u32 %v2424_v63, %v2205_v61  ;;  %v2146_v6 = vor.u32 %v2407_v0, %v2143_v1  ;;  %v2133_v7 = vld [vmem:[#allocation7 + $0x10] sm:$0xf]  ;;  %v2406_v8 = vld [vmem:[#allocation7 + $0x14] sm:$0xf0] }
  0x45   : > { %869 = vmatpush.bf16.msra.mxu2 %v2162_v46  ;;  %v2197_v9 = vld [vmem:[#allocation7 + $0x90] sm:$0xf]  ;;  %v2210_v10 = vor.u32 %v2423_v2, %v2207_v3  ;;  %v2422_v11 = vld [vmem:[#allocation7 + $0x94] sm:$0xf0]  ;;  %v2405_v12 = vld [vmem:[#allocation7 + $0x14] sm:$0xf]  ;;  %v2134_v16 = vor.u32 %v2406_v8, %v2133_v7 }
  0x46   : > { %918 = vmatpush.bf16.msra.mxu3 %v2226_v50  ;;  %v2135_v13 = vld [vmem:[#allocation7 + $0x18] sm:$0xf0]  ;;  %v2421_v14 = vld [vmem:[#allocation7 + $0x94] sm:$0xf]  ;;  %v2125_v17 = vld [vmem:[#allocation7] sm:$0xf]  ;;  %v2198_v19 = vor.u32 %v2422_v11, %v2197_v9 }
  0x47   : > { %772 = vmatpush.bf16.msra.mxu0 %v2150_v56  ;;  %v2199_v15 = vld [vmem:[#allocation7 + $0x98] sm:$0xf0]  ;;  %v2404_v18 = vld [vmem:[#allocation7 + $0x4] sm:$0xf0]  ;;  %v2138_v20 = vor.u32 %v2405_v12, %v2135_v13  ;;  %v2189_v21 = vld [vmem:[#allocation7 + $0x80] sm:$0xf] }
  0x48   : > { %821 = vmatpush.bf16.msra.mxu1 %v2214_v57  ;;  %v2420_v22 = vld [vmem:[#allocation7 + $0x84] sm:$0xf0]  ;;  %v2403_v23 = vld [vmem:[#allocation7 + $0x4] sm:$0xf]  ;;  %v2202_v24 = vor.u32 %v2421_v14, %v2199_v15  ;;  %v2127_v25 = vld [vmem:[#allocation7 + $0x8] sm:$0xf0]  ;;  %v2126_v31 = vor.u32 %v2404_v18, %v2125_v17 }
  0x49   : > { %870 = vmatpush.bf16.msra.mxu2 %v2154_v58  ;;  %v2419_v26 = vld [vmem:[#allocation7 + $0x84] sm:$0xf]  ;;  %v2191_v27 = vld [vmem:[#allocation7 + $0x88] sm:$0xf0]  ;;  %v2061_v28 = vld [vmem:[%s3071_s24] sm:$0xf]  ;;  %v2190_v35 = vor.u32 %v2420_v22, %v2189_v21  ;;  %v2130_v36 = vor.u32 %v2403_v23, %v2127_v25 }
  0x4a   : > { %919 = vmatpush.bf16.msra.mxu3 %v2218_v62  ;;  %v2449_v29 = vld [vmem:[#allocation10 + $0x74] sm:$0xf]  ;;  %v2311_v30 = vld [vmem:[#allocation10 + $0x78] sm:$0xf0]  ;;  %v2388_v32 = vld [vmem:[%s3071_s24 + $0x4] sm:$0xf0]  ;;  %v2194_v39 = vor.u32 %v2419_v26, %v2191_v27 }
  0x4b   : > { %773 = vmatpush.bf16.msra.mxu0 %v2142_v4  ;;  %v2465_v33 = vld [vmem:[#allocation10 + $0xf4] sm:$0xf]  ;;  %v2375_v34 = vld [vmem:[#allocation10 + $0xf8] sm:$0xf0]  ;;  %v2387_v37 = vld [vmem:[%s3071_s24 + $0x4] sm:$0xf]  ;;  %v2314_v40 = vor.u32 %v2449_v29, %v2311_v30  ;;  %v3089_v44 = vor.u32 %v2388_v32, %v2061_v28 }
  0x4c   : > { %822 = vmatpush.bf16.msra.mxu1 %v2206_v5  ;;  %v2063_v38 = vld [vmem:[%s3071_s24 + $0x8] sm:$0xf0]  ;;  %v2309_v41 = vld [vmem:[#allocation10 + $0x70] sm:$0xf]  ;;  %v2450_v42 = vld [vmem:[#allocation10 + $0x74] sm:$0xf0]  ;;  %v2378_v45 = vor.u32 %v2465_v33, %v2375_v34 }
  0x4d   : > { %871 = vmatpush.bf16.msra.mxu2 %v2146_v6  ;;  %v2373_v43 = vld [vmem:[#allocation10 + $0xf0] sm:$0xf]  ;;  %v2466_v46 = vld [vmem:[#allocation10 + $0xf4] sm:$0xf0]  ;;  %v2447_v47 = vld [vmem:[#allocation10 + $0x64] sm:$0xf]  ;;  %v3091_v49 = vor.u32 %v2387_v37, %v2063_v38  ;;  %v2310_v52 = vor.u32 %v2450_v42, %v2309_v41 }
  0x4e   : > { %920 = vmatpush.bf16.msra.mxu3 %v2210_v10  ;;  %v2303_v48 = vld [vmem:[#allocation10 + $0x68] sm:$0xf0]  ;;  %v2463_v50 = vld [vmem:[#allocation10 + $0xe4] sm:$0xf]  ;;  %v2374_v53 = vor.u32 %v2466_v46, %v2373_v43  ;;  %v2301_v55 = vld [vmem:[#allocation10 + $0x60] sm:$0xf] }
  0x4f   : > { %774 = vmatpush.bf16.msra.mxu0 %v2134_v16  ;;  %v2367_v51 = vld [vmem:[#allocation10 + $0xe8] sm:$0xf0]  ;;  %v2306_v54 = vor.u32 %v2447_v47, %v2303_v48  ;;  %v2448_v56 = vld [vmem:[#allocation10 + $0x64] sm:$0xf0]  ;;  %v2365_v58 = vld [vmem:[#allocation10 + $0xe0] sm:$0xf] }
  0x50   : > { %823 = vmatpush.bf16.msra.mxu1 %v2198_v19  ;;  %v2370_v57 = vor.u32 %v2463_v50, %v2367_v51  ;;  %v2464_v59 = vld [vmem:[#allocation10 + $0xe4] sm:$0xf0]  ;;  %v2302_v60 = vor.u32 %v2448_v56, %v2301_v55  ;;  %v2445_v61 = vld [vmem:[#allocation10 + $0x54] sm:$0xf]  ;;  %v2295_v62 = vld [vmem:[#allocation10 + $0x58] sm:$0xf0] }
  0x51   : > { %872 = vmatpush.bf16.msra.mxu2 %v2138_v20  ;;  %v2461_v63 = vld [vmem:[#allocation10 + $0xd4] sm:$0xf]  ;;  %v2366_v0 = vor.u32 %v2464_v59, %v2365_v58  ;;  %v2298_v1 = vor.u32 %v2445_v61, %v2295_v62  ;;  %v2359_v2 = vld [vmem:[#allocation10 + $0xd8] sm:$0xf0]  ;;  %v2293_v3 = vld [vmem:[#allocation10 + $0x50] sm:$0xf] }
  0x52   : > { %921 = vmatpush.bf16.msra.mxu3 %v2202_v24  ;;  %v2446_v4 = vld [vmem:[#allocation10 + $0x54] sm:$0xf0]  ;;  %v2362_v5 = vor.u32 %v2461_v63, %v2359_v2  ;;  %v2357_v6 = vld [vmem:[#allocation10 + $0xd0] sm:$0xf]  ;;  %v2443_v16 = vld [vmem:[#allocation10 + $0x44] sm:$0xf] }
  0x53   : > { %775 = vmatpush.bf16.msra.mxu0 %v2126_v31  ;;  %v2462_v7 = vld [vmem:[#allocation10 + $0xd4] sm:$0xf0]  ;;  %v2294_v8 = vor.u32 %v2446_v4, %v2293_v3  ;;  %v2069_v10 = vld [vmem:[%s3071_s24 + $0x10] sm:$0xf]  ;;  %v2389_v12 = vld [vmem:[%s3071_s24 + $0x14] sm:$0xf] }
  0x54   : > { %824 = vmatpush.bf16.msra.mxu1 %v2190_v35  ;;  %v2358_v9 = vor.u32 %v2462_v7, %v2357_v6  ;;  %v2390_v11 = vld [vmem:[%s3071_s24 + $0x14] sm:$0xf0]  ;;  %v2071_v13 = vld [vmem:[%s3071_s24 + $0x18] sm:$0xf0]  ;;  %v2287_v17 = vld [vmem:[#allocation10 + $0x48] sm:$0xf0] }
  0x55   : > { %873 = vmatpush.bf16.msra.mxu2 %v2130_v36  ;;  %v3101_v14 = vor.u32 %v2390_v11, %v2069_v10  ;;  %v3103_v15 = vor.u32 %v2389_v12, %v2071_v13  ;;  %v2459_v18 = vld [vmem:[#allocation10 + $0xc4] sm:$0xf]  ;;  %v2290_v19 = vor.u32 %v2443_v16, %v2287_v17  ;;  %v2351_v20 = vld [vmem:[#allocation10 + $0xc8] sm:$0xf0]  ;;  %v2285_v21 = vld [vmem:[#allocation10 + $0x40] sm:$0xf] }
  0x56   : > { %922 = vmatpush.bf16.msra.mxu3 %v2194_v39  ;;  %776 = vmatmul.bf16.vlgmr.msra.gmra.mxu0 %v3089_v44  ;;  %v2444_v22 = vld [vmem:[#allocation10 + $0x44] sm:$0xf0]  ;;  %v2354_v23 = vor.u32 %v2459_v18, %v2351_v20  ;;  %v2349_v25 = vld [vmem:[#allocation10 + $0xc0] sm:$0xf]  ;;  %v2441_v34 = vld [vmem:[#allocation10 + $0x34] sm:$0xf] }
  0x57   : > { %825 = vmatmul.bf16.vlgmr.msra.gmra.mxu1 %v3091_v49  ;;  %1252 = vmatpush.bf16.msrb.mxu0 %v2310_v52  ;;  %v2286_v24 = vor.u32 %v2444_v22, %v2285_v21  ;;  %v2460_v26 = vld [vmem:[#allocation10 + $0xc4] sm:$0xf0]  ;;  %v2077_v28 = vld [vmem:[%s3071_s24 + $0x20] sm:$0xf]  ;;  %v2391_v30 = vld [vmem:[%s3071_s24 + $0x24] sm:$0xf] }
  0x58   : > { %874 = vmatmul.bf16.vlgmr.msra.gmra.mxu2 %v3089_v44  ;;  %1301 = vmatpush.bf16.msrb.mxu1 %v2374_v53  ;;  %v2350_v27 = vor.u32 %v2460_v26, %v2349_v25  ;;  %v2392_v29 = vld [vmem:[%s3071_s24 + $0x24] sm:$0xf0]  ;;  %v2079_v31 = vld [vmem:[%s3071_s24 + $0x28] sm:$0xf0]  ;;  %v2279_v35 = vld [vmem:[#allocation10 + $0x38] sm:$0xf0] }
  0x59   : > { %1350 = vmatpush.bf16.msrb.mxu2 %v2314_v40  ;;  %923 = vmatmul.bf16.vlgmr.msra.gmra.mxu3 %v3091_v49  ;;  %v3113_v32 = vor.u32 %v2392_v29, %v2077_v28  ;;  %v3115_v33 = vor.u32 %v2391_v30, %v2079_v31  ;;  %v2457_v36 = vld [vmem:[#allocation10 + $0xb4] sm:$0xf]  ;;  %v2282_v37 = vor.u32 %v2441_v34, %v2279_v35  ;;  %v2343_v38 = vld [vmem:[#allocation10 + $0xb8] sm:$0xf0]  ;;  %v2277_v39 = vld [vmem:[#allocation10 + $0x30] sm:$0xf] }
  0x5a   : > { %1399 = vmatpush.bf16.msrb.mxu3 %v2378_v45  ;;  %v2442_v40 = vld [vmem:[#allocation10 + $0x34] sm:$0xf0]  ;;  %v2346_v41 = vor.u32 %v2457_v36, %v2343_v38  ;;  %v2341_v43 = vld [vmem:[#allocation10 + $0xb0] sm:$0xf]  ;;  %v2271_v55 = vld [vmem:[#allocation10 + $0x28] sm:$0xf0] }
  0x5b   : > { %1253 = vmatpush.bf16.msrb.mxu0 %v2302_v60  ;;  %v2278_v42 = vor.u32 %v2442_v40, %v2277_v39  ;;  %v2458_v45 = vld [vmem:[#allocation10 + $0xb4] sm:$0xf0]  ;;  %v2085_v47 = vld [vmem:[%s3071_s24 + $0x30] sm:$0xf]  ;;  %v2393_v50 = vld [vmem:[%s3071_s24 + $0x34] sm:$0xf] }
  0x5c   : > { %1302 = vmatpush.bf16.msrb.mxu1 %v2366_v0  ;;  %v2342_v46 = vor.u32 %v2458_v45, %v2341_v43  ;;  %v2394_v48 = vld [vmem:[%s3071_s24 + $0x34] sm:$0xf0]  ;;  %v2087_v51 = vld [vmem:[%s3071_s24 + $0x38] sm:$0xf0]  ;;  %v2455_v56 = vld [vmem:[#allocation10 + $0xa4] sm:$0xf] }
  0x5d   : > { %1351 = vmatpush.bf16.msrb.mxu2 %v2306_v54  ;;  %v3125_v52 = vor.u32 %v2394_v48, %v2085_v47  ;;  %v3127_v53 = vor.u32 %v2393_v50, %v2087_v51  ;;  %v2439_v54 = vld [vmem:[#allocation10 + $0x24] sm:$0xf]  ;;  %v2335_v58 = vld [vmem:[#allocation10 + $0xa8] sm:$0xf0]  ;;  %v2269_v59 = vld [vmem:[#allocation10 + $0x20] sm:$0xf] }
  0x5e   : > { %1400 = vmatpush.bf16.msrb.mxu3 %v2370_v57  ;;  %v2274_v57 = vor.u32 %v2439_v54, %v2271_v55  ;;  %v2440_v60 = vld [vmem:[#allocation10 + $0x24] sm:$0xf0]  ;;  %v2338_v61 = vor.u32 %v2455_v56, %v2335_v58  ;;  %v2333_v63 = vld [vmem:[#allocation10 + $0xa0] sm:$0xf]  ;;  %v2453_v10 = vld [vmem:[#allocation10 + $0x94] sm:$0xf] }
  0x5f   : > { %1254 = vmatpush.bf16.msrb.mxu0 %v2294_v8  ;;  %v2270_v62 = vor.u32 %v2440_v60, %v2269_v59  ;;  %v2456_v0 = vld [vmem:[#allocation10 + $0xa4] sm:$0xf0]  ;;  %v2093_v2 = vld [vmem:[%s3071_s24 + $0x40] sm:$0xf]  ;;  %v2395_v4 = vld [vmem:[%s3071_s24 + $0x44] sm:$0xf] }
  0x60   : > { %1303 = vmatpush.bf16.msrb.mxu1 %v2358_v9  ;;  %v2396_v3 = vld [vmem:[%s3071_s24 + $0x44] sm:$0xf0]  ;;  %v2437_v8 = vld [vmem:[#allocation10 + $0x14] sm:$0xf]  ;;  %v2263_v9 = vld [vmem:[#allocation10 + $0x18] sm:$0xf0] }
  0x61   : > { %1352 = vmatpush.bf16.msrb.mxu2 %v2298_v1  ;;  %v2334_v1 = vor.u32 %v2456_v0, %v2333_v63  ;;  %v3137_v6 = vor.u32 %v2396_v3, %v2093_v2  ;;  %v2266_v11 = vor.u32 %v2437_v8, %v2263_v9  ;;  %v2327_v12 = vld [vmem:[#allocation10 + $0x98] sm:$0xf0]  ;;  %v2261_v13 = vld [vmem:[#allocation10 + $0x10] sm:$0xf]  ;;  %v2438_v16 = vld [vmem:[#allocation10 + $0x14] sm:$0xf0] }
  0x62   : > { %1401 = vmatpush.bf16.msrb.mxu3 %v2362_v5  ;;  %v2095_v5 = vld [vmem:[%s3071_s24 + $0x48] sm:$0xf0]  ;;  %v2330_v17 = vor.u32 %v2453_v10, %v2327_v12  ;;  %v2262_v18 = vor.u32 %v2438_v16, %v2261_v13  ;;  %v2454_v20 = vld [vmem:[#allocation10 + $0x94] sm:$0xf0]  ;;  %v2101_v22 = vld [vmem:[%s3071_s24 + $0x50] sm:$0xf] }
  0x63   : > { %1255 = vmatpush.bf16.msrb.mxu0 %v2286_v24  ;;  %v3139_v7 = vor.u32 %v2395_v4, %v2095_v5  ;;  %v2397_v24 = vld [vmem:[%s3071_s24 + $0x54] sm:$0xf]  ;;  %v2103_v25 = vld [vmem:[%s3071_s24 + $0x58] sm:$0xf0]  ;;  %v2435_v28 = vld [vmem:[#allocation10 + $0x4] sm:$0xf] }
  0x64   : > { %1304 = vmatpush.bf16.msrb.mxu1 %v2350_v27  ;;  %v3151_v27 = vor.u32 %v2397_v24, %v2103_v25  ;;  %v2255_v29 = vld [vmem:[#allocation10 + $0x8] sm:$0xf0]  ;;  %v2451_v30 = vld [vmem:[#allocation10 + $0x84] sm:$0xf]  ;;  %v2253_v35 = vld [vmem:[#allocation10] sm:$0xf] }
  0x65   : > { %1353 = vmatpush.bf16.msrb.mxu2 %v2290_v19  ;;  %v2325_v19 = vld [vmem:[#allocation10 + $0x90] sm:$0xf]  ;;  %v2258_v31 = vor.u32 %v2435_v28, %v2255_v29  ;;  %v2319_v34 = vld [vmem:[#allocation10 + $0x88] sm:$0xf0]  ;;  %v2436_v36 = vld [vmem:[#allocation10 + $0x4] sm:$0xf0] }
  0x66   : > { %781 = vmatmul.bf16.gmra.mxu0 %v3101_v14  ;;  %1402 = vmatpush.bf16.msrb.mxu3 %v2354_v23  ;;  %v2326_v21 = vor.u32 %v2454_v20, %v2325_v19  ;;  %v2398_v23 = vld [vmem:[%s3071_s24 + $0x54] sm:$0xf0]  ;;  %v2254_v38 = vor.u32 %v2436_v36, %v2253_v35  ;;  %v2317_v39 = vld [vmem:[#allocation10 + $0x80] sm:$0xf]  ;;  %v2452_v40 = vld [vmem:[#allocation10 + $0x84] sm:$0xf0] }
  0x67   : > { %830 = vmatmul.bf16.gmra.mxu1 %v3103_v15  ;;  %1256 = vmatpush.bf16.msrb.mxu0 %v2278_v42  ;;  %v3149_v26 = vor.u32 %v2398_v23, %v2101_v22  ;;  %v2109_v42 = vld [vmem:[%s3071_s24 + $0x60] sm:$0xf]  ;;  %v2400_v43 = vld [vmem:[%s3071_s24 + $0x64] sm:$0xf0]  ;;  %v2399_v45 = vld [vmem:[%s3071_s24 + $0x64] sm:$0xf] }
  0x68   : > { %879 = vmatmul.bf16.gmra.mxu2 %v3101_v14  ;;  %1305 = vmatpush.bf16.msrb.mxu1 %v2342_v46  ;;  %v2111_v46 = vld [vmem:[%s3071_s24 + $0x68] sm:$0xf0]  ;;  %v3161_v47 = vor.u32 %v2400_v43, %v2109_v42  ;;  %v2117_v50 = vld [vmem:[%s3071_s24 + $0x70] sm:$0xf]  ;;  %v2402_v51 = vld [vmem:[%s3071_s24 + $0x74] sm:$0xf0] }
  0x69   : > { %928 = vmatmul.bf16.gmra.mxu3 %v3103_v15  ;;  %1354 = vmatpush.bf16.msrb.mxu2 %v2282_v37  ;;  %v2322_v37 = vor.u32 %v2451_v30, %v2319_v34  ;;  %v3163_v48 = vor.u32 %v2399_v45, %v2111_v46  ;;  %v2401_v54 = vld [vmem:[%s3071_s24 + $0x74] sm:$0xf]  ;;  %v2119_v55 = vld [vmem:[%s3071_s24 + $0x78] sm:$0xf0]  ;;  %v3173_v56 = vor.u32 %v2402_v51, %v2117_v50  ;;  %s2058_s3 = sshll.u32 %s3067_s10, 8  ;;  %s2468_s28 = sshll.u32 %s2896_s21, 8 }
  0x6a   : > { %1403 = vmatpush.bf16.msrb.mxu3 %v2346_v41  ;;  %v2318_v41 = vor.u32 %v2452_v40, %v2317_v39  ;;  %s3297_s26 = scalar_lea.vmem [#allocation12], %s2058_s3  ;;  %s1894_s13 = scalar_lea.hbm %s3463_s5, %s2468_s28 }
  0x6b   : > { %1257 = vmatpush.bf16.msrb.mxu0 %v2270_v62  ;;  %s1895_s17 = sshll.u32 %s3297_s26, 4  ;;  %s1897_s21 = sshll.u32 %s1894_s13, 4  ;;  %s1896_s17 = int_to_ptr.vmem [resolvable:$true] %s1895_s17  ;;  %s1898_s21 = int_to_ptr.hbm [resolvable:$true] %s1897_s21 }
  0x6c   : > { %1306 = vmatpush.bf16.msrb.mxu1 %v2334_v1  ;;  %s1880_s30 = scalar_lea.sflag [#allocation6], %s3067_s10  ;;  %s2828_s6 = sshra.s32 %s1898_s21, 4  ;;  %s2829_s6 = int_to_ptr.hbm [resolvable:$true] %s2828_s6 }
  0x6d   : > { %1355 = vmatpush.bf16.msrb.mxu2 %v2274_v57  ;;  %v3175_v57 = vor.u32 %v2401_v54, %v2119_v55  ;;  %s2830_s9 = scalar_lea.hbm %s2829_s6, 256  ;;  %s2834_s15 = scalar_lea.hbm %s3463_s5, 512 }
  0x6e   : > { %1404 = vmatpush.bf16.msrb.mxu3 %v2338_v61  ;;  %p2831_p1 = scmp.ne.s32.totalorder %s2829_s6, %s2830_s9  ;;  %p2835_p10 = scmp.lt.s32.totalorder %s2829_s6, %s3463_s5 }
  0x6f   : > { %1258 = vmatpush.bf16.msrb.mxu0 %v2262_v18  ;;  %p2836_p12 = scmp.lt.s32.totalorder %s2834_s15, %s2830_s9 }
  0x70   : > { %1307 = vmatpush.bf16.msrb.mxu1 %v2326_v21  ;;  %p2832_p4 = pnand %p2831_p1, %p3044_p5 }
  0x71   : > { %1356 = vmatpush.bf16.msrb.mxu2 %v2266_v11  ;;  %p2837_p13 = por %p2836_p12, %p2835_p10 }
  0x72   : > { %1405 = vmatpush.bf16.msrb.mxu3 %v2330_v17  ;;  %p2833_p8 = pneg %p2832_p4 }
  0x73   : > { %1259 = vmatpush.bf16.msrb.mxu0 %v2254_v38 }
  0x74   : > { %1308 = vmatpush.bf16.msrb.mxu1 %v2318_v41  ;;  %p2838_p0 = pnand %p2837_p13, %p2833_p8 }
  0x75   : > { %1357 = vmatpush.bf16.msrb.mxu2 %v2258_v31 }
  0x76   : > { %786 = vmatmul.bf16.gmra.mxu0 %v3113_v32  ;;  %1406 = vmatpush.bf16.msrb.mxu3 %v2322_v37 }
  0x77   : > { %835 = vmatmul.bf16.gmra.mxu1 %v3115_v33 }
  0x78   : > { %884 = vmatmul.bf16.gmra.mxu2 %v3113_v32 }
  0x79   : > { %933 = vmatmul.bf16.gmra.mxu3 %v3115_v33 }
  0x86   : > { %791 = vmatmul.bf16.gmra.mxu0 %v3125_v52 }
  0x87   : > { %840 = vmatmul.bf16.gmra.mxu1 %v3127_v53 }
  0x88   : > { %889 = vmatmul.bf16.gmra.mxu2 %v3125_v52 }
  0x89   : > { %938 = vmatmul.bf16.gmra.mxu3 %v3127_v53 }
  0x96   : > { %796 = vmatmul.bf16.gmra.mxu0 %v3137_v6 }
  0x97   : > { %845 = vmatmul.bf16.gmra.mxu1 %v3139_v7 }
  0x98   : > { %894 = vmatmul.bf16.gmra.mxu2 %v3137_v6 }
  0x99   : > { %943 = vmatmul.bf16.gmra.mxu3 %v3139_v7 }
  0xa6   : > { %801 = vmatmul.bf16.gmra.mxu0 %v3149_v26 }
  0xa7   : > { %850 = vmatmul.bf16.gmra.mxu1 %v3151_v27 }
  0xa8   : > { %899 = vmatmul.bf16.gmra.mxu2 %v3149_v26 }
  0xa9   : > { %948 = vmatmul.bf16.gmra.mxu3 %v3151_v27 }
  0xb6   : > { %806 = vmatmul.bf16.gmra.mxu0 %v3161_v47 }
  0xb7   : > { %855 = vmatmul.bf16.gmra.mxu1 %v3163_v48 }
  0xb8   : > { %904 = vmatmul.bf16.gmra.mxu2 %v3161_v47 }
  0xb9   : > { %953 = vmatmul.bf16.gmra.mxu3 %v3163_v48 }
  0xc6   : > { %811 = vmatmul.bf16.gmra.mxu0 %v3173_v56 }
  0xc7   : > { %860 = vmatmul.bf16.gmra.mxu1 %v3175_v57 }
  0xc8   : > { %909 = vmatmul.bf16.gmra.mxu2 %v3173_v56 }
  0xc9   : > { %958 = vmatmul.bf16.gmra.mxu3 %v3175_v57 }
  0xd3   : > { %v777_v58 = vpop.f32.mrf.mxu0 }
  0xd4   : > { %v826_v59 = vpop.f32.mrf.mxu1 }
  0xd5   : > { %v3181_v60 = vadd.f32 %v826_v59, %v777_v58 }
  0xd6   : > { %1260 = vmatmul.bf16.vlgmr.msrb.gmra.mxu0 %v3089_v44 }
  0xd7   : > { %1309 = vmatmul.bf16.vlgmr.msrb.gmra.mxu1 %v3091_v49 }
  0xd8   : > { %1358 = vmatmul.bf16.vlgmr.msrb.gmra.mxu2 %v3089_v44 }
  0xd9   : > { %1407 = vmatmul.bf16.vlgmr.msrb.gmra.mxu3 %v3091_v49 }
  0xdb   : > { %v875_v61 = vpop.f32.mrf.mxu2  ;;  %v779_v63 = vpop.f32.mrf.mxu0 }
  0xdc   : > { %v924_v62 = vpop.f32.mrf.mxu3  ;;  %v828_v1 = vpop.f32.mrf.mxu1 }
  0xdd   : > { %v3187_v0 = vadd.f32 %v924_v62, %v875_v61  ;;  %v3189_v2 = vadd.f32 %v828_v1, %v779_v63 }
  0xe3   : > { %v877_v3 = vpop.f32.mrf.mxu2  ;;  %v782_v5 = vpop.f32.mrf.mxu0 }
  0xe4   : > { %v926_v4 = vpop.f32.mrf.mxu3  ;;  %v831_v9 = vpop.f32.mrf.mxu1 }
  0xe5   : > { %v3191_v8 = vadd.f32 %v926_v4, %v877_v3  ;;  %v3193_v10 = vadd.f32 %v831_v9, %v782_v5 }
  0xe6   : > { %1265 = vmatmul.bf16.gmra.mxu0 %v3101_v14 }
  0xe7   : > { %1314 = vmatmul.bf16.gmra.mxu1 %v3103_v15 }
  0xe8   : > { %1363 = vmatmul.bf16.gmra.mxu2 %v3101_v14 }
  0xe9   : > { %1412 = vmatmul.bf16.gmra.mxu3 %v3103_v15 }
  0xeb   : > { %v880_v44 = vpop.f32.mrf.mxu2  ;;  %v784_v11 = vpop.f32.mrf.mxu0 }
  0xec   : > { %v929_v49 = vpop.f32.mrf.mxu3  ;;  %v833_v13 = vpop.f32.mrf.mxu1 }
  0xed   : > { %v3199_v12 = vadd.f32 %v929_v49, %v880_v44  ;;  %v3201_v16 = vadd.f32 %v833_v13, %v784_v11 }
  0xf3   : > { %v882_v17 = vpop.f32.mrf.mxu2  ;;  %v787_v19 = vpop.f32.mrf.mxu0 }
  0xf4   : > { %v931_v18 = vpop.f32.mrf.mxu3  ;;  %v836_v21 = vpop.f32.mrf.mxu1 }
  0xf5   : > { %v3203_v20 = vadd.f32 %v931_v18, %v882_v17  ;;  %v3205_v22 = vadd.f32 %v836_v21, %v787_v19 }
  0xf6   : > { %1270 = vmatmul.bf16.gmra.mxu0 %v3113_v32 }
  0xf7   : > { %1319 = vmatmul.bf16.gmra.mxu1 %v3115_v33 }
  0xf8   : > { %1368 = vmatmul.bf16.gmra.mxu2 %v3113_v32 }
  0xf9   : > { %1417 = vmatmul.bf16.gmra.mxu3 %v3115_v33 }
  0xfb   : > { %v885_v14 = vpop.f32.mrf.mxu2  ;;  %v789_v23 = vpop.f32.mrf.mxu0 }
  0xfc   : > { %v934_v15 = vpop.f32.mrf.mxu3  ;;  %v838_v25 = vpop.f32.mrf.mxu1 }
  0xfd   : > { %v3211_v24 = vadd.f32 %v934_v15, %v885_v14  ;;  %v3213_v28 = vadd.f32 %v838_v25, %v789_v23 }
 0x103   : > { %v887_v29 = vpop.f32.mrf.mxu2  ;;  %v792_v31 = vpop.f32.mrf.mxu0 }
 0x104   : > { %v936_v30 = vpop.f32.mrf.mxu3  ;;  %v841_v35 = vpop.f32.mrf.mxu1 }
 0x105   : > { %v3215_v34 = vadd.f32 %v936_v30, %v887_v29  ;;  %v3217_v36 = vadd.f32 %v841_v35, %v792_v31 }
 0x106   : > { %1275 = vmatmul.bf16.gmra.mxu0 %v3125_v52 }
 0x107   : > { %1324 = vmatmul.bf16.gmra.mxu1 %v3127_v53 }
 0x108   : > { %1373 = vmatmul.bf16.gmra.mxu2 %v3125_v52 }
 0x109   : > { %1422 = vmatmul.bf16.gmra.mxu3 %v3127_v53 }
 0x10b   : > { %v890_v32 = vpop.f32.mrf.mxu2  ;;  %v794_v37 = vpop.f32.mrf.mxu0 }
 0x10c   : > { %v939_v33 = vpop.f32.mrf.mxu3  ;;  %v843_v39 = vpop.f32.mrf.mxu1 }
 0x10d   : > { %v3223_v38 = vadd.f32 %v939_v33, %v890_v32  ;;  %v3225_v40 = vadd.f32 %v843_v39, %v794_v37 }
 0x113   : > { %v892_v41 = vpop.f32.mrf.mxu2  ;;  %v797_v43 = vpop.f32.mrf.mxu0 }
 0x114   : > { %v941_v42 = vpop.f32.mrf.mxu3  ;;  %v846_v46 = vpop.f32.mrf.mxu1 }
 0x115   : > { %v3227_v45 = vadd.f32 %v941_v42, %v892_v41  ;;  %v3229_v50 = vadd.f32 %v846_v46, %v797_v43  ;;  %v1617_v42 = vld [vmem:[%s3462_s4] sm:$0x3] }
 0x116   : > { %1280 = vmatmul.bf16.gmra.mxu0 %v3137_v6 }
 0x117   : > { %1329 = vmatmul.bf16.gmra.mxu1 %v3139_v7 }
 0x118   : > { %1378 = vmatmul.bf16.gmra.mxu2 %v3137_v6 }
 0x119   : > { %1427 = vmatmul.bf16.gmra.mxu3 %v3139_v7 }
 0x11b   : > { %v895_v52 = vpop.f32.mrf.mxu2  ;;  %v799_v51 = vpop.f32.mrf.mxu0 }
 0x11c   : > { %v944_v53 = vpop.f32.mrf.mxu3  ;;  %v848_v55 = vpop.f32.mrf.mxu1 }
 0x11d   : > { %v3235_v54 = vadd.f32 %v944_v53, %v895_v52  ;;  %v3237_v58 = vadd.f32 %v848_v55, %v799_v51  ;;  %v3278_v53 = vperm.slane %v1617_v42, 0 }
 0x123   : > { %v897_v59 = vpop.f32.mrf.mxu2  ;;  %v802_v62 = vpop.f32.mrf.mxu0 }
 0x124   : > { %v946_v61 = vpop.f32.mrf.mxu3  ;;  %v851_v1 = vpop.f32.mrf.mxu1 }
 0x125   : > { %v3239_v63 = vadd.f32 %v946_v61, %v897_v59  ;;  %v3241_v3 = vadd.f32 %v851_v1, %v802_v62  ;;  %v3283_v62 = vperm.slane %v1617_v42, 1 }
 0x126   : > { %1285 = vmatmul.bf16.gmra.mxu0 %v3149_v26 }
 0x127   : > { %1334 = vmatmul.bf16.gmra.mxu1 %v3151_v27 }
 0x128   : > { %1383 = vmatmul.bf16.gmra.mxu2 %v3149_v26 }
 0x129   : > { %1432 = vmatmul.bf16.gmra.mxu3 %v3151_v27 }
 0x12b   : > { %v900_v6 = vpop.f32.mrf.mxu2  ;;  %v804_v4 = vpop.f32.mrf.mxu0 }
 0x12c   : > { %v949_v7 = vpop.f32.mrf.mxu3  ;;  %v853_v9 = vpop.f32.mrf.mxu1 }
 0x12d   : > { %v3247_v5 = vadd.f32 %v949_v7, %v900_v6  ;;  %v3249_v44 = vadd.f32 %v853_v9, %v804_v4 }
 0x133   : > { %v902_v49 = vpop.f32.mrf.mxu2  ;;  %v807_v13 = vpop.f32.mrf.mxu0 }
 0x134   : > { %v951_v11 = vpop.f32.mrf.mxu3  ;;  %v856_v18 = vpop.f32.mrf.mxu1 }
 0x135   : > { %v3251_v17 = vadd.f32 %v951_v11, %v902_v49  ;;  %v3253_v19 = vadd.f32 %v856_v18, %v807_v13 }
 0x136   : > { %1290 = vmatmul.bf16.gmra.mxu0 %v3161_v47 }
 0x137   : > { %1339 = vmatmul.bf16.gmra.mxu1 %v3163_v48 }
 0x138   : > { %1388 = vmatmul.bf16.gmra.mxu2 %v3161_v47 }
 0x139   : > { %1437 = vmatmul.bf16.gmra.mxu3 %v3163_v48 }
 0x13b   : > { %v905_v26 = vpop.f32.mrf.mxu2  ;;  %v809_v21 = vpop.f32.mrf.mxu0 }
 0x13c   : > { %v954_v27 = vpop.f32.mrf.mxu3  ;;  %v858_v15 = vpop.f32.mrf.mxu1 }
 0x13d   : > { %v3259_v14 = vadd.f32 %v954_v27, %v905_v26  ;;  %v3261_v23 = vadd.f32 %v858_v15, %v809_v21 }
 0x143   : > { %v907_v25 = vpop.f32.mrf.mxu2  ;;  %v812_v30 = vpop.f32.mrf.mxu0 }
 0x144   : > { %v956_v29 = vpop.f32.mrf.mxu3  ;;  %v861_v35 = vpop.f32.mrf.mxu1 }
 0x145   : > { %v3263_v31 = vadd.f32 %v956_v29, %v907_v25  ;;  %v3265_v32 = vadd.f32 %v861_v35, %v812_v30  ;;  %v1547_v35 = vld [vmem:[#allocation9] sm:$0x3] }
 0x146   : > { %1295 = vmatmul.bf16.gmra.mxu0 %v3173_v56 }
 0x147   : > { %1344 = vmatmul.bf16.gmra.mxu1 %v3175_v57 }
 0x148   : > { %1393 = vmatmul.bf16.gmra.mxu2 %v3173_v56 }
 0x149   : > { %1442 = vmatmul.bf16.gmra.mxu3 %v3175_v57 }
 0x14b   : > { %v910_v47 = vpop.f32.mrf.mxu2  ;;  %v814_v33 = vpop.f32.mrf.mxu0 }
 0x14c   : > { %v959_v48 = vpop.f32.mrf.mxu3  ;;  %v863_v39 = vpop.f32.mrf.mxu1 }
 0x14d   : > { %v3271_v37 = vadd.f32 %v959_v48, %v910_v47  ;;  %v3273_v41 = vadd.f32 %v863_v39, %v814_v33 }
 0x153   : > { %v912_v43 = vpop.f32.mrf.mxu2  ;;  %v1261_v52 = vpop.f32.mrf.mxu0 }
 0x154   : > { %v961_v46 = vpop.f32.mrf.mxu3  ;;  %v1310_v57 = vpop.f32.mrf.mxu1 }
 0x155   : > { %v3280_v56 = vadd.f32 %v961_v46, %v912_v43  ;;  %v1311_v51 = vadd.f32 %v1310_v57, %v1261_v52  ;;  %v3288_v43 = vperm.slane %v1547_v35, 0 }
 0x157   : > { %v1623_v55 = vadd.f32 %v3278_v53, %v1311_v51 }
 0x159   : > { %v1655_v59 = vsub.f32 0.0, %v1623_v55 }
 0x15b   : > { %v1359_v61 = vpop.f32.mrf.mxu2  ;;  %v1687_v1 = vmul.f32 1.442695, %v1655_v59  ;;  %v1263_v7 = vpop.f32.mrf.mxu0 }
 0x15c   : > { %v1408_v6 = vpop.f32.mrf.mxu3  ;;  %v1312_v9 = vpop.f32.mrf.mxu1 }
 0x15d   : > { %v1409_v4 = vadd.f32 %v1408_v6, %v1359_v61  ;;  %2566 = vpow2.f32 %v1687_v1  ;;  %v1313_v49 = vadd.f32 %v1312_v9, %v1263_v7  ;;  %v1553_v1 = vadd.f32 %v3288_v43, %v3181_v60 }
 0x15f   : > { %v1624_v11 = vadd.f32 %v3283_v62, %v1409_v4  ;;  %v1625_v13 = vadd.f32 %v3278_v53, %v1313_v49 }
 0x161   : > { %v1656_v18 = vsub.f32 0.0, %v1624_v11  ;;  %v1657_v26 = vsub.f32 0.0, %v1625_v13 }
 0x163   : > { %v1689_v27 = vmul.f32 1.442695, %v1656_v18  ;;  %v1361_v21 = vpop.f32.mrf.mxu2  ;;  %v2567_v15 = vpop.eup %2566  ;;  %v1691_v25 = vmul.f32 1.442695, %v1657_v26 }
 0x164   : > { %v1410_v29 = vpop.f32.mrf.mxu3  ;;  %v1266_v30 = vpop.f32.mrf.mxu0  ;;  %v1751_v47 = vadd.f32 1.0, %v2567_v15 }
 0x165   : > { %2568 = vpow2.f32 %v1689_v27  ;;  %v1411_v48 = vadd.f32 %v1410_v29, %v1361_v21  ;;  %v1315_v33 = vpop.f32.mrf.mxu1  ;;  %v3294_v21 = vperm.slane %v1547_v35, 1 }
 0x166   : > { %2570 = vpow2.f32 %v1691_v25  ;;  %v1316_v39 = vadd.f32 %v1315_v33, %v1266_v30 }
 0x167   : > { %2572 = vrcp.f32 %v1751_v47  ;;  %v1626_v42 = vadd.f32 %v3283_v62, %v1411_v48  ;;  %v1554_v47 = vadd.f32 %v3294_v21, %v3187_v0 }
 0x168   : > { %v1627_v46 = vadd.f32 %v3278_v53, %v1316_v39  ;;  %v1555_v39 = vadd.f32 %v3288_v43, %v3189_v2 }
 0x169   : > { %v1658_v52 = vsub.f32 0.0, %v1626_v42 }
 0x16a   : > { %v1659_v57 = vsub.f32 0.0, %v1627_v46 }
 0x16b   : > { %v2569_v51 = vpop.eup %2568  ;;  %v1693_v55 = vmul.f32 1.442695, %v1658_v52  ;;  %v1364_v59 = vpop.f32.mrf.mxu2 }
 0x16c   : > { %v2571_v61 = vpop.eup %2570  ;;  %v1752_v6 = vadd.f32 1.0, %v2569_v51  ;;  %v1695_v7 = vmul.f32 1.442695, %v1659_v57  ;;  %v1413_v4 = vpop.f32.mrf.mxu3 }
 0x16d   : > { %v1268_v9 = vpop.f32.mrf.mxu0  ;;  %v2573_v49 = vpop.eup %2572  ;;  %v1753_v11 = vadd.f32 1.0, %v2571_v61  ;;  %2574 = vpow2.f32 %v1693_v55  ;;  %v1414_v13 = vadd.f32 %v1413_v4, %v1364_v59 }
 0x16e   : > { %v1317_v18 = vpop.f32.mrf.mxu1  ;;  %v1815_v26 = vmul.f32 %v2573_v49, %v1553_v1  ;;  %2576 = vrcp.f32 %v1752_v6 }
 0x16f   : > { %v1318_v27 = vadd.f32 %v1317_v18, %v1268_v9  ;;  %2578 = vrcp.f32 %v1753_v11  ;;  %v1628_v15 = vadd.f32 %v3283_v62, %v1414_v13  ;;  %v1556_v13 = vadd.f32 %v3294_v21, %v3191_v8 }
 0x170   : > { %1847 = vst [vmem:[%s3297_s26] sm:$0xff] %v1815_v26  ;;  %2580 = vpow2.f32 %v1695_v7 }
 0x171   : > { %v1629_v60 = vadd.f32 %v3278_v53, %v1318_v27  ;;  %v1660_v25 = vsub.f32 0.0, %v1628_v15 }
 0x173   : > { %v1661_v29 = vsub.f32 0.0, %v1629_v60  ;;  %v2575_v30 = vpop.eup %2574  ;;  %v1697_v48 = vmul.f32 1.442695, %v1660_v25  ;;  %v1366_v33 = vpop.f32.mrf.mxu2 }
 0x174   : > { %v2577_v35 = vpop.eup %2576  ;;  %v1754_v42 = vadd.f32 1.0, %v2575_v30  ;;  %v1415_v52 = vpop.f32.mrf.mxu3 }
 0x175   : > { %v1699_v46 = vmul.f32 1.442695, %v1661_v29  ;;  %v1271_v57 = vpop.f32.mrf.mxu0  ;;  %v2579_v51 = vpop.eup %2578  ;;  %v1816_v55 = vmul.f32 %v2577_v35, %v1554_v47  ;;  %2582 = vpow2.f32 %v1697_v48  ;;  %v1416_v59 = vadd.f32 %v1415_v52, %v1366_v33 }
 0x176   : > { %v1320_v61 = vpop.f32.mrf.mxu1  ;;  %v2581_v1 = vpop.eup %2580  ;;  %v1817_v6 = vmul.f32 %v2579_v51, %v1555_v39  ;;  %2584 = vrcp.f32 %v1754_v42  ;;  %v1557_v35 = vadd.f32 %v3288_v43, %v3193_v10 }
 0x177   : > { %v1321_v0 = vadd.f32 %v1320_v61, %v1271_v57  ;;  %1848 = vst [vmem:[%s3297_s26 + $0x8] sm:$0xff] %v1816_v55  ;;  %v1755_v7 = vadd.f32 1.0, %v2581_v1  ;;  %2586 = vpow2.f32 %v1699_v46  ;;  %v1630_v4 = vadd.f32 %v3283_v62, %v1416_v59 }
 0x178   : > { %1849 = vst [vmem:[%s3297_s26 + $0x10] sm:$0xff] %v1817_v6  ;;  %v1558_v61 = vadd.f32 %v3294_v21, %v3199_v12 }
 0x179   : > { %v1631_v2 = vadd.f32 %v3278_v53, %v1321_v0  ;;  %2588 = vrcp.f32 %v1755_v7  ;;  %v1662_v9 = vsub.f32 0.0, %v1630_v4 }
 0x17b   : > { %v1663_v49 = vsub.f32 0.0, %v1631_v2  ;;  %v2583_v11 = vpop.eup %2582  ;;  %v1701_v18 = vmul.f32 1.442695, %v1662_v9  ;;  %v1369_v26 = vpop.f32.mrf.mxu2 }
 0x17c   : > { %v2585_v27 = vpop.eup %2584  ;;  %v1756_v15 = vadd.f32 1.0, %v2583_v11  ;;  %v1418_v25 = vpop.f32.mrf.mxu3 }
 0x17d   : > { %v1703_v60 = vmul.f32 1.442695, %v1663_v49  ;;  %v1273_v29 = vpop.f32.mrf.mxu0  ;;  %v2587_v30 = vpop.eup %2586  ;;  %v1818_v47 = vmul.f32 %v2585_v27, %v1556_v13  ;;  %2590 = vpow2.f32 %v1701_v18  ;;  %v1419_v48 = vadd.f32 %v1418_v25, %v1369_v26 }
 0x17e   : > { %v1322_v33 = vpop.f32.mrf.mxu1  ;;  %2592 = vrcp.f32 %v1756_v15  ;;  %v1757_v39 = vadd.f32 1.0, %v2587_v30  ;;  %v1559_v49 = vadd.f32 %v3288_v43, %v3201_v16 }
 0x17f   : > { %v1323_v8 = vadd.f32 %v1322_v33, %v1273_v29  ;;  %v2589_v42 = vpop.eup %2588  ;;  %1850 = vst [vmem:[%s3297_s26 + $0x18] sm:$0xff] %v1818_v47  ;;  %2594 = vpow2.f32 %v1703_v60  ;;  %v1632_v46 = vadd.f32 %v3283_v62, %v1419_v48  ;;  %v1560_v47 = vadd.f32 %v3294_v21, %v3203_v20 }
 0x180   : > { %v1819_v52 = vmul.f32 %v2589_v42, %v1557_v35  ;;  %2596 = vrcp.f32 %v1757_v39 }
 0x181   : > { %v1633_v57 = vadd.f32 %v3278_v53, %v1323_v8  ;;  %v1664_v51 = vsub.f32 0.0, %v1632_v46 }
 0x182   : > { %1851 = vst [vmem:[%s3297_s26 + $0x20] sm:$0xff] %v1819_v52 }
 0x183   : > { %v1665_v55 = vsub.f32 0.0, %v1633_v57  ;;  %v2591_v59 = vpop.eup %2590  ;;  %v1705_v10 = vmul.f32 1.442695, %v1664_v51  ;;  %v1371_v1 = vpop.f32.mrf.mxu2  ;;  %v1561_v57 = vadd.f32 %v3288_v43, %v3205_v22 }
 0x184   : > { %v2593_v6 = vpop.eup %2592  ;;  %v1758_v0 = vadd.f32 1.0, %v2591_v59  ;;  %v1420_v4 = vpop.f32.mrf.mxu3 }
 0x185   : > { %v1707_v7 = vmul.f32 1.442695, %v1665_v55  ;;  %v1276_v2 = vpop.f32.mrf.mxu0  ;;  %v2595_v9 = vpop.eup %2594  ;;  %v1820_v11 = vmul.f32 %v2593_v6, %v1558_v61  ;;  %2598 = vpow2.f32 %v1705_v10  ;;  %v1421_v13 = vadd.f32 %v1420_v4, %v1371_v1 }
 0x186   : > { %v1325_v18 = vpop.f32.mrf.mxu1  ;;  %v2597_v26 = vpop.eup %2596  ;;  %2600 = vrcp.f32 %v1758_v0  ;;  %v1759_v12 = vadd.f32 1.0, %v2595_v9 }
 0x187   : > { %v1326_v27 = vadd.f32 %v1325_v18, %v1276_v2  ;;  %1852 = vst [vmem:[%s3297_s26 + $0x28] sm:$0xff] %v1820_v11  ;;  %v1821_v15 = vmul.f32 %v2597_v26, %v1559_v49  ;;  %2602 = vpow2.f32 %v1707_v7  ;;  %v1634_v60 = vadd.f32 %v3283_v62, %v1421_v13 }
 0x188   : > { %2604 = vrcp.f32 %v1759_v12  ;;  %v1562_v2 = vadd.f32 %v3294_v21, %v3211_v24 }
 0x189   : > { %v1635_v25 = vadd.f32 %v3278_v53, %v1326_v27  ;;  %1853 = vst [vmem:[%s3297_s26 + $0x30] sm:$0xff] %v1821_v15  ;;  %v1666_v29 = vsub.f32 0.0, %v1634_v60  ;;  %v1563_v15 = vadd.f32 %v3288_v43, %v3213_v28 }
 0x18b   : > { %v1667_v30 = vsub.f32 0.0, %v1635_v25  ;;  %v2599_v16 = vpop.eup %2598  ;;  %v1709_v48 = vmul.f32 1.442695, %v1666_v29  ;;  %v1374_v33 = vpop.f32.mrf.mxu2 }
 0x18c   : > { %v2601_v35 = vpop.eup %2600  ;;  %v1760_v39 = vadd.f32 1.0, %v2599_v16  ;;  %v1423_v42 = vpop.f32.mrf.mxu3 }
 0x18d   : > { %v1711_v8 = vmul.f32 1.442695, %v1667_v30  ;;  %v1278_v46 = vpop.f32.mrf.mxu0  ;;  %v2603_v52 = vpop.eup %2602  ;;  %v1822_v51 = vmul.f32 %v2601_v35, %v1560_v47  ;;  %2606 = vpow2.f32 %v1709_v48  ;;  %v1424_v55 = vadd.f32 %v1423_v42, %v1374_v33 }
 0x18e   : > { %v1327_v59 = vpop.f32.mrf.mxu1  ;;  %v2605_v61 = vpop.eup %2604  ;;  %2608 = vrcp.f32 %v1760_v39  ;;  %v1761_v20 = vadd.f32 1.0, %v2603_v52 }
 0x18f   : > { %v1328_v10 = vadd.f32 %v1327_v59, %v1278_v46  ;;  %1854 = vst [vmem:[%s3297_s26 + $0x38] sm:$0xff] %v1822_v51  ;;  %v1823_v1 = vmul.f32 %v2605_v61, %v1561_v57  ;;  %2610 = vpow2.f32 %v1711_v8  ;;  %v1636_v6 = vadd.f32 %v3283_v62, %v1424_v55 }
 0x190   : > { %2612 = vrcp.f32 %v1761_v20  ;;  %v1564_v8 = vadd.f32 %v3294_v21, %v3215_v34  ;;  %v1565_v20 = vadd.f32 %v3288_v43, %v3217_v36 }
 0x191   : > { %v1637_v0 = vadd.f32 %v3278_v53, %v1328_v10  ;;  %1855 = vst [vmem:[%s3297_s26 + $0x40] sm:$0xff] %v1823_v1  ;;  %v1668_v7 = vsub.f32 0.0, %v1636_v6 }
 0x193   : > { %v1669_v4 = vsub.f32 0.0, %v1637_v0  ;;  %v2607_v22 = vpop.eup %2606  ;;  %v1713_v9 = vmul.f32 1.442695, %v1668_v7  ;;  %v1376_v49 = vpop.f32.mrf.mxu2 }
 0x194   : > { %v2609_v11 = vpop.eup %2608  ;;  %v1762_v13 = vadd.f32 1.0, %v2607_v22  ;;  %v1425_v26 = vpop.f32.mrf.mxu3 }
 0x195   : > { %v1715_v18 = vmul.f32 1.442695, %v1669_v4  ;;  %v1281_v12 = vpop.f32.mrf.mxu0  ;;  %v2611_v27 = vpop.eup %2610  ;;  %v1824_v60 = vmul.f32 %v2609_v11, %v1562_v2  ;;  %2614 = vpow2.f32 %v1713_v9  ;;  %v1426_v25 = vadd.f32 %v1425_v26, %v1376_v49 }
 0x196   : > { %v1330_v29 = vpop.f32.mrf.mxu1  ;;  %v2613_v30 = vpop.eup %2612  ;;  %2616 = vrcp.f32 %v1762_v13  ;;  %v1763_v24 = vadd.f32 1.0, %v2611_v27  ;;  %v1566_v11 = vadd.f32 %v3294_v21, %v3223_v38 }
 0x197   : > { %v1331_v16 = vadd.f32 %v1330_v29, %v1281_v12  ;;  %1856 = vst [vmem:[%s3297_s26 + $0x48] sm:$0xff] %v1824_v60  ;;  %v1825_v47 = vmul.f32 %v2613_v30, %v1563_v15  ;;  %2618 = vpow2.f32 %v1715_v18  ;;  %v1638_v48 = vadd.f32 %v3283_v62, %v1426_v25 }
 0x198   : > { %2620 = vrcp.f32 %v1763_v24  ;;  %v1567_v29 = vadd.f32 %v3288_v43, %v3225_v40 }
 0x199   : > { %v1639_v33 = vadd.f32 %v3278_v53, %v1331_v16  ;;  %1857 = vst [vmem:[%s3297_s26 + $0x50] sm:$0xff] %v1825_v47  ;;  %v1670_v35 = vsub.f32 0.0, %v1638_v48 }
 0x19b   : > { %v1671_v39 = vsub.f32 0.0, %v1639_v33  ;;  %v2615_v28 = vpop.eup %2614  ;;  %v1717_v42 = vmul.f32 1.442695, %v1670_v35  ;;  %v1379_v46 = vpop.f32.mrf.mxu2 }
 0x19c   : > { %v2617_v52 = vpop.eup %2616  ;;  %v1764_v57 = vadd.f32 1.0, %v2615_v28  ;;  %v1428_v55 = vpop.f32.mrf.mxu3 }
 0x19d   : > { %v1719_v51 = vmul.f32 1.442695, %v1671_v39  ;;  %v1283_v59 = vpop.f32.mrf.mxu0  ;;  %v2619_v61 = vpop.eup %2618  ;;  %v1826_v10 = vmul.f32 %v2617_v52, %v1564_v8  ;;  %2622 = vpow2.f32 %v1717_v42  ;;  %v1429_v1 = vadd.f32 %v1428_v55, %v1379_v46 }
 0x19e   : > { %v1332_v6 = vpop.f32.mrf.mxu1  ;;  %v2621_v0 = vpop.eup %2620  ;;  %2624 = vrcp.f32 %v1764_v57  ;;  %v1765_v34 = vadd.f32 1.0, %v2619_v61  ;;  %v1568_v42 = vadd.f32 %v3294_v21, %v3227_v45 }
 0x19f   : > { %v1333_v7 = vadd.f32 %v1332_v6, %v1283_v59  ;;  %1858 = vst [vmem:[%s3297_s26 + $0x58] sm:$0xff] %v1826_v10  ;;  %v1827_v4 = vmul.f32 %v2621_v0, %v1565_v20  ;;  %2626 = vpow2.f32 %v1719_v51  ;;  %v1640_v22 = vadd.f32 %v3283_v62, %v1429_v1 }
 0x1a0   : > { %2628 = vrcp.f32 %v1765_v34  ;;  %v1569_v10 = vadd.f32 %v3288_v43, %v3229_v50 }
 0x1a1   : > { %v1641_v2 = vadd.f32 %v3278_v53, %v1333_v7  ;;  %1859 = vst [vmem:[%s3297_s26 + $0x60] sm:$0xff] %v1827_v4  ;;  %v1672_v9 = vsub.f32 0.0, %v1640_v22 }
 0x1a3   : > { %v1673_v49 = vsub.f32 0.0, %v1641_v2  ;;  %v2623_v36 = vpop.eup %2622  ;;  %v1721_v13 = vmul.f32 1.442695, %v1672_v9  ;;  %v1381_v18 = vpop.f32.mrf.mxu2 }
 0x1a4   : > { %v2625_v26 = vpop.eup %2624  ;;  %v1766_v12 = vadd.f32 1.0, %v2623_v36  ;;  %v1430_v15 = vpop.f32.mrf.mxu3  ;;  %v1570_v36 = vadd.f32 %v3294_v21, %v3235_v54 }
 0x1a5   : > { %v1723_v27 = vmul.f32 1.442695, %v1673_v49  ;;  %v1286_v60 = vpop.f32.mrf.mxu0  ;;  %v2627_v25 = vpop.eup %2626  ;;  %v1828_v30 = vmul.f32 %v2625_v26, %v1566_v11  ;;  %2630 = vpow2.f32 %v1721_v13  ;;  %v1431_v24 = vadd.f32 %v1430_v15, %v1381_v18 }
 0x1a6   : > { %v1335_v16 = vpop.f32.mrf.mxu1  ;;  %v2629_v47 = vpop.eup %2628  ;;  %2632 = vrcp.f32 %v1766_v12  ;;  %v1767_v38 = vadd.f32 1.0, %v2627_v25  ;;  %v1571_v25 = vadd.f32 %v3288_v43, %v3237_v58 }
 0x1a7   : > { %v1336_v48 = vadd.f32 %v1335_v16, %v1286_v60  ;;  %1860 = vst [vmem:[%s3297_s26 + $0x68] sm:$0xff] %v1828_v30  ;;  %v1829_v33 = vmul.f32 %v2629_v47, %v1567_v29  ;;  %2634 = vpow2.f32 %v1723_v27  ;;  %v1642_v35 = vadd.f32 %v3283_v62, %v1431_v24 }
 0x1a8   : > { %2636 = vrcp.f32 %v1767_v38 }
 0x1a9   : > { %v1643_v39 = vadd.f32 %v3278_v53, %v1336_v48  ;;  %1861 = vst [vmem:[%s3297_s26 + $0x70] sm:$0xff] %v1829_v33  ;;  %v1674_v28 = vsub.f32 0.0, %v1642_v35 }
 0x1ab   : > { %v1675_v8 = vsub.f32 0.0, %v1643_v39  ;;  %v2631_v40 = vpop.eup %2630  ;;  %v1725_v46 = vmul.f32 1.442695, %v1674_v28  ;;  %v1384_v52 = vpop.f32.mrf.mxu2  ;;  %v1572_v28 = vadd.f32 %v3294_v21, %v3239_v63 }
 0x1ac   : > { %v2633_v57 = vpop.eup %2632  ;;  %v1768_v51 = vadd.f32 1.0, %v2631_v40  ;;  %v1433_v59 = vpop.f32.mrf.mxu3 }
 0x1ad   : > { %v1727_v55 = vmul.f32 1.442695, %v1675_v8  ;;  %v1288_v61 = vpop.f32.mrf.mxu0  ;;  %v2635_v20 = vpop.eup %2634  ;;  %v1830_v1 = vmul.f32 %v2633_v57, %v1568_v42  ;;  %2638 = vpow2.f32 %v1725_v46  ;;  %v1434_v6 = vadd.f32 %v1433_v59, %v1384_v52 }
 0x1ae   : > { %v1337_v0 = vpop.f32.mrf.mxu1  ;;  %v2637_v34 = vpop.eup %2636  ;;  %2640 = vrcp.f32 %v1768_v51  ;;  %v1769_v45 = vadd.f32 1.0, %v2635_v20  ;;  %v1573_v59 = vadd.f32 %v3288_v43, %v3241_v3 }
 0x1af   : > { %v1338_v7 = vadd.f32 %v1337_v0, %v1288_v61  ;;  %1862 = vst [vmem:[%s3297_s26 + $0x78] sm:$0xff] %v1830_v1  ;;  %v1831_v4 = vmul.f32 %v2637_v34, %v1569_v10  ;;  %2642 = vpow2.f32 %v1727_v55  ;;  %v1644_v22 = vadd.f32 %v3283_v62, %v1434_v6 }
 0x1b0   : > { %2644 = vrcp.f32 %v1769_v45 }
 0x1b1   : > { %v1645_v2 = vadd.f32 %v3278_v53, %v1338_v7  ;;  %1863 = vst [vmem:[%s3297_s26 + $0x80] sm:$0xff] %v1831_v4  ;;  %v1676_v9 = vsub.f32 0.0, %v1644_v22  ;;  %v1574_v22 = vadd.f32 %v3294_v21, %v3247_v5 }
 0x1b3   : > { %v1677_v49 = vsub.f32 0.0, %v1645_v2  ;;  %v2639_v50 = vpop.eup %2638  ;;  %v1729_v11 = vmul.f32 1.442695, %v1676_v9  ;;  %v1386_v13 = vpop.f32.mrf.mxu2 }
 0x1b4   : > { %v2641_v18 = vpop.eup %2640  ;;  %v1770_v26 = vadd.f32 1.0, %v2639_v50  ;;  %v1435_v27 = vpop.f32.mrf.mxu3 }
 0x1b5   : > { %v1731_v12 = vmul.f32 1.442695, %v1677_v49  ;;  %v1291_v15 = vpop.f32.mrf.mxu0  ;;  %v2643_v60 = vpop.eup %2642  ;;  %v1832_v29 = vmul.f32 %v2641_v18, %v1570_v36  ;;  %2646 = vpow2.f32 %v1729_v11  ;;  %v1436_v30 = vadd.f32 %v1435_v27, %v1386_v13 }
 0x1b6   : > { %v1340_v24 = vpop.f32.mrf.mxu1  ;;  %v2645_v16 = vpop.eup %2644  ;;  %2648 = vrcp.f32 %v1770_v26  ;;  %v1771_v54 = vadd.f32 1.0, %v2643_v60  ;;  %v1575_v26 = vadd.f32 %v3288_v43, %v3249_v44 }
 0x1b7   : > { %v1341_v47 = vadd.f32 %v1340_v24, %v1291_v15  ;;  %1864 = vst [vmem:[%s3297_s26 + $0x88] sm:$0xff] %v1832_v29  ;;  %v1833_v38 = vmul.f32 %v2645_v16, %v1571_v25  ;;  %2650 = vpow2.f32 %v1731_v12  ;;  %v1646_v48 = vadd.f32 %v3283_v62, %v1436_v30 }
 0x1b8   : > { %2652 = vrcp.f32 %v1771_v54 }
 0x1b9   : > { %v1647_v33 = vadd.f32 %v3278_v53, %v1341_v47  ;;  %1865 = vst [vmem:[%s3297_s26 + $0x90] sm:$0xff] %v1833_v38  ;;  %v1678_v35 = vsub.f32 0.0, %v1646_v48  ;;  %v1576_v47 = vadd.f32 %v3294_v21, %v3251_v17 }
 0x1bb   : > { %v1679_v39 = vsub.f32 0.0, %v1647_v33  ;;  %v2647_v58 = vpop.eup %2646  ;;  %v1733_v8 = vmul.f32 1.442695, %v1678_v35  ;;  %v1389_v40 = vpop.f32.mrf.mxu2 }
 0x1bc   : > { %v2649_v42 = vpop.eup %2648  ;;  %v1772_v46 = vadd.f32 1.0, %v2647_v58  ;;  %v1438_v57 = vpop.f32.mrf.mxu3 }
 0x1bd   : > { %v1735_v52 = vmul.f32 1.442695, %v1679_v39  ;;  %v1293_v51 = vpop.f32.mrf.mxu0  ;;  %v2651_v55 = vpop.eup %2650  ;;  %v1834_v61 = vmul.f32 %v2649_v42, %v1572_v28  ;;  %2654 = vpow2.f32 %v1733_v8  ;;  %v1439_v20 = vadd.f32 %v1438_v57, %v1389_v40 }
 0x1be   : > { %v1342_v10 = vpop.f32.mrf.mxu1  ;;  %v2653_v1 = vpop.eup %2652  ;;  %2656 = vrcp.f32 %v1772_v46  ;;  %v1773_v63 = vadd.f32 1.0, %v2651_v55  ;;  %v1577_v40 = vadd.f32 %v3288_v43, %v3253_v19 }
 0x1bf   : > { %v1343_v6 = vadd.f32 %v1342_v10, %v1293_v51  ;;  %1866 = vst [vmem:[%s3297_s26 + $0x98] sm:$0xff] %v1834_v61  ;;  %v1835_v0 = vmul.f32 %v2653_v1, %v1573_v59  ;;  %2658 = vpow2.f32 %v1735_v52  ;;  %v1648_v34 = vadd.f32 %v3283_v62, %v1439_v20 }
 0x1c0   : > { %2660 = vrcp.f32 %v1773_v63  ;;  %v1578_v1 = vadd.f32 %v3294_v21, %v3259_v14 }
 0x1c1   : > { %v1649_v45 = vadd.f32 %v3278_v53, %v1343_v6  ;;  %1867 = vst [vmem:[%s3297_s26 + $0xa0] sm:$0xff] %v1835_v0  ;;  %v1680_v7 = vsub.f32 0.0, %v1648_v34 }
 0x1c3   : > { %v1681_v4 = vsub.f32 0.0, %v1649_v45  ;;  %v2655_v3 = vpop.eup %2654  ;;  %v1737_v2 = vmul.f32 1.442695, %v1680_v7  ;;  %v1391_v9 = vpop.f32.mrf.mxu2 }
 0x1c4   : > { %v2657_v49 = vpop.eup %2656  ;;  %v1774_v50 = vadd.f32 1.0, %v2655_v3  ;;  %v1440_v11 = vpop.f32.mrf.mxu3  ;;  %v1579_v3 = vadd.f32 %v3288_v43, %v3261_v23  ;;  %v1580_v23 = vadd.f32 %v3294_v21, %v3263_v31 }
 0x1c5   : > { %v1739_v36 = vmul.f32 1.442695, %v1681_v4  ;;  %v1296_v13 = vpop.f32.mrf.mxu0  ;;  %v2659_v18 = vpop.eup %2658  ;;  %v1836_v12 = vmul.f32 %v2657_v49, %v1574_v22  ;;  %2662 = vpow2.f32 %v1737_v2  ;;  %v1441_v27 = vadd.f32 %v1440_v11, %v1391_v9 }
 0x1c6   : > { %v1345_v15 = vpop.f32.mrf.mxu1  ;;  %v2661_v60 = vpop.eup %2660  ;;  %2664 = vrcp.f32 %v1774_v50  ;;  %v1775_v5 = vadd.f32 1.0, %v2659_v18 }
 0x1c7   : > { %v1346_v25 = vadd.f32 %v1345_v15, %v1296_v13  ;;  %1868 = vst [vmem:[%s3297_s26 + $0xa8] sm:$0xff] %v1836_v12  ;;  %v1837_v29 = vmul.f32 %v2661_v60, %v1575_v26  ;;  %2666 = vpow2.f32 %v1739_v36  ;;  %v1650_v30 = vadd.f32 %v3283_v62, %v1441_v27 }
 0x1c8   : > { %2668 = vrcp.f32 %v1775_v5  ;;  %v1581_v12 = vadd.f32 %v3288_v43, %v3265_v32  ;;  %v1582_v5 = vadd.f32 %v3294_v21, %v3271_v37  ;;  %v1583_v32 = vadd.f32 %v3288_v43, %v3273_v41 }
 0x1c9   : > { %v1651_v24 = vadd.f32 %v3278_v53, %v1346_v25  ;;  %1869 = vst [vmem:[%s3297_s26 + $0xb0] sm:$0xff] %v1837_v29  ;;  %v1682_v16 = vsub.f32 0.0, %v1650_v30  ;;  %v1584_v37 = vadd.f32 %v3294_v21, %v3280_v56 }
 0x1cb   : > { %v1683_v54 = vsub.f32 0.0, %v1651_v24  ;;  %v2663_v44 = vpop.eup %2662  ;;  %v1741_v38 = vmul.f32 1.442695, %v1682_v16  ;;  %v1394_v48 = vpop.f32.mrf.mxu2 }
 0x1cc   : > { %v2665_v33 = vpop.eup %2664  ;;  %v1776_v35 = vadd.f32 1.0, %v2663_v44  ;;  %v1443_v58 = vpop.f32.mrf.mxu3 }
 0x1cd   : > { %v1743_v39 = vmul.f32 1.442695, %v1683_v54  ;;  %v1298_v28 = vpop.f32.mrf.mxu0  ;;  %v2667_v8 = vpop.eup %2666  ;;  %v1838_v42 = vmul.f32 %v2665_v33, %v1576_v47  ;;  %2670 = vpow2.f32 %v1741_v38  ;;  %v1444_v46 = vadd.f32 %v1443_v58, %v1394_v48 }
 0x1ce   : > { %v1347_v52 = vpop.f32.mrf.mxu1  ;;  %v2669_v57 = vpop.eup %2668  ;;  %2672 = vrcp.f32 %v1776_v35  ;;  %v1777_v17 = vadd.f32 1.0, %v2667_v8 }
 0x1cf   : > { %v1348_v51 = vadd.f32 %v1347_v52, %v1298_v28  ;;  %1870 = vst [vmem:[%s3297_s26 + $0xb8] sm:$0xff] %v1838_v42  ;;  %v1839_v55 = vmul.f32 %v2669_v57, %v1577_v40  ;;  %2674 = vpow2.f32 %v1743_v39  ;;  %v1652_v59 = vadd.f32 %v3283_v62, %v1444_v46 }
 0x1d0   : > { %2676 = vrcp.f32 %v1777_v17 }
 0x1d1   : > { %v1653_v61 = vadd.f32 %v3278_v53, %v1348_v51  ;;  %1871 = vst [vmem:[%s3297_s26 + $0xc0] sm:$0xff] %v1839_v55  ;;  %v1684_v20 = vsub.f32 0.0, %v1652_v59 }
 0x1d3   : > { %v1685_v10 = vsub.f32 0.0, %v1653_v61  ;;  %v2671_v19 = vpop.eup %2670  ;;  %v1745_v63 = vmul.f32 1.442695, %v1684_v20  ;;  %v1396_v6 = vpop.f32.mrf.mxu2 }
 0x1d4   : > { %v2673_v0 = vpop.eup %2672  ;;  %v1778_v34 = vadd.f32 1.0, %v2671_v19  ;;  %v1445_v7 = vpop.f32.mrf.mxu3 }
 0x1d5   : > { %v1747_v45 = vmul.f32 1.442695, %v1685_v10  ;;  %v2675_v4 = vpop.eup %2674  ;;  %v1840_v53 = vmul.f32 %v2673_v0, %v1578_v1  ;;  %2678 = vpow2.f32 %v1745_v63  ;;  %v1446_v22 = vadd.f32 %v1445_v7, %v1396_v6 }
 0x1d6   : > { %v2677_v2 = vpop.eup %2676  ;;  %2680 = vrcp.f32 %v1778_v34  ;;  %v1779_v9 = vadd.f32 1.0, %v2675_v4 }
 0x1d7   : > { %1872 = vst [vmem:[%s3297_s26 + $0xc8] sm:$0xff] %v1840_v53  ;;  %v1841_v49 = vmul.f32 %v2677_v2, %v1579_v3  ;;  %2682 = vpow2.f32 %v1747_v45  ;;  %v1654_v14 = vadd.f32 %v3283_v62, %v1446_v22 }
 0x1d8   : > { %2684 = vrcp.f32 %v1779_v9 }
 0x1d9   : > { %1873 = vst [vmem:[%s3297_s26 + $0xd0] sm:$0xff] %v1841_v49  ;;  %v1686_v50 = vsub.f32 0.0, %v1654_v14 }
 0x1db   : > { %v2679_v36 = vpop.eup %2678  ;;  %v1749_v11 = vmul.f32 1.442695, %v1686_v50 }
 0x1dc   : > { %v2681_v13 = vpop.eup %2680  ;;  %v1780_v18 = vadd.f32 1.0, %v2679_v36 }
 0x1dd   : > { %v2683_v26 = vpop.eup %2682  ;;  %v1842_v27 = vmul.f32 %v2681_v13, %v1580_v23  ;;  %2686 = vpow2.f32 %v1749_v11 }
 0x1de   : > { %v2685_v62 = vpop.eup %2684  ;;  %2688 = vrcp.f32 %v1780_v18  ;;  %v1781_v15 = vadd.f32 1.0, %v2683_v26 }
 0x1df   : > { %1874 = vst [vmem:[%s3297_s26 + $0xd8] sm:$0xff] %v1842_v27  ;;  %v1843_v60 = vmul.f32 %v2685_v62, %v1581_v12 }
 0x1e0   : > { %2690 = vrcp.f32 %v1781_v15 }
 0x1e1   : > { %1875 = vst [vmem:[%s3297_s26 + $0xe0] sm:$0xff] %v1843_v60 }
 0x1e3   : > { %v2687_v31 = vpop.eup %2686 }
 0x1e4   : > { %v2689_v25 = vpop.eup %2688  ;;  %v1782_v29 = vadd.f32 1.0, %v2687_v31 }
 0x1e5   : > { %v1844_v30 = vmul.f32 %v2689_v25, %v1582_v5 }
 0x1e6   : > { %v2691_v24 = vpop.eup %2690  ;;  %2692 = vrcp.f32 %v1782_v29 }
 0x1e7   : > { %1876 = vst [vmem:[%s3297_s26 + $0xe8] sm:$0xff] %v1844_v30  ;;  %v1845_v16 = vmul.f32 %v2691_v24, %v1583_v32 }
 0x1e9   : > { %1877 = vst [vmem:[%s3297_s26 + $0xf0] sm:$0xff] %v1845_v16 }
 0x1ec   : > { %v2693_v54 = vpop.eup %2692 }
 0x1ed   : > { %v1846_v41 = vmul.f32 %v2693_v54, %v1584_v37 }
 0x1ef   : > { %1878 = vst [vmem:[%s3297_s26 + $0xf8] sm:$0xff] %v1846_v41 }
 0x1f0   : > { %2841 = shalt.err (!%p2838_p0)
}
 0x1f1   : > { %s2911_s10 = smov 256   ;;  %s2912_s1 = smov 16  }
 0x1f2   : > { %2483 = dma.vmem_to_hbm [thread:$0]  (%p3044_p5), %s1896_s17, 4096, %s1898_s21, %s1880_s30, %s2911_s10, %s2911_s10, %s2912_s1  }
 0x1f3 PF: > { %s1912_s2 = sand.u32 1, %s2884_s18   ;;  %p2500_p3 = pnand %p2048_p11, %p2992_p6 }
 0x1f4   : > { %s1913_s3 = scalar_lea.sflag [#allocation6], %s1912_s2 }
 0x1f5   : > { %p2501_p7 = pneg %p2500_p3 }
 0x1f7   : > { %2879 = dma.done.wait (%p2501_p7), %s1913_s3, 4096  }
 0x1f8   : > { %2881 = vsyncadd (%p2501_p7), %s1913_s3, 4294963200  ;;  %s23_s23 = sadd.s32 1, %s2904_s23   ;;  %s3482_s18 = smov %s2888_s19 }
 0x1f9   : > { %p20_p9 = scmp.ge.s32.totalorder %s23_s23, 4   ;;  %s3483_s19 = smov %s2892_s20 }
 0x1fa   : > { %s3484_s20 = smov %s3053_s25  ;;  %s3485_s21 = smov %s2900_s22 }
 0x1fb   : > { %s3486_s22 = smov %s3488_s7  ;;  %22 = sbr.rel (!%p20_p9) target bundleno = 12 (0xc), region = 111 }
 0x200   :  { %1919 = vsyncpa [#allocation5], 1 }
 0x201   :  { %1921 = vsyncpa [#allocation5 + $0x1], 1 }
 0x202   :  { %1922 = vsyncpa [#allocation8], 1 }
 0x203   :  { %1923 = vsyncpa [#allocation11], 1 }
 0x204   :  { %1924 = vsyncpa [#allocation6], 1 }
 0x205   :  { %1926 = vsyncpa [#allocation6 + $0x1], 1 }

</bundles_post_ra>
